<compile_context>
chip_gen: v7x
topology: tpu7x:2x2x1
jax: 0.10.0
libtpu: 0.0.40
codegen_flags: <defaults>
</compile_context>

<pallas_src>
import functools
import math

import jax
import jax.numpy as jnp
from jax.experimental import pallas as pl
from jax.experimental.pallas import tpu as pltpu

# ----------------------- small synthetic RoBERTa config -----------------------
BATCH = 2
SEQ = 8
HIDDEN = 32          # stands in for 768
NUM_HEADS = 4
HEAD_DIM = HIDDEN // NUM_HEADS
INTERMEDIATE = 64
NUM_LAYERS = 2
VOCAB = 64
MAX_POS = 32
NUM_CLASSES = 6
PAD_ID = 1           # RoBERTa padding_idx
LN_EPS = 1e-5


# ------------------------------ fused whole-model kernel ----------------------
def _webattack_fused_kernel(
    emb_ref, mask_ref,
    emb_ln_g_ref, emb_ln_b_ref,
    qkv_w_ref, qkv_b_ref,
    ao_w_ref, ao_b_ref,
    ln1_g_ref, ln1_b_ref,
    i_w_ref, i_b_ref,
    fo_w_ref, fo_b_ref,
    ln2_g_ref, ln2_b_ref,
    fc_w_ref, fc_b_ref,
    o_ref,
):
    """Whole RoBERTa-encoder forward + mean-pool + classifier in one kernel.

    emb_ref : [B*S, H]   summed (word + pos + type) embeddings
    mask_ref: [B, 1, S]  additive attention mask (0 or -inf-ish)
    stacked per-layer weights have leading dim NUM_LAYERS.
    o_ref   : [B, NUM_CLASSES]
    """
    scale = 1.0 / math.sqrt(HEAD_DIM)

    def _ln(h, g, b):
        mu = jnp.mean(h, axis=-1, keepdims=True)
        var = jnp.mean(jnp.square(h - mu), axis=-1, keepdims=True)
        return (h - mu) * jax.lax.rsqrt(var + LN_EPS) * g + b

    # embedding LayerNorm (no fake zero residual)
    x = _ln(emb_ref[...], emb_ln_g_ref[...], emb_ln_b_ref[...])     # [B*S, H]
    add_mask = mask_ref[...]                                        # [B, 1, S]

    for l in range(NUM_LAYERS):                                     # static unroll
        # ---- fused QKV projection: one wide matmul, lane dim 3H ----
        qkv = (jnp.dot(x, qkv_w_ref[l], preferred_element_type=jnp.float32)
               + qkv_b_ref[l])                                      # [B*S, 3H]
        q = qkv[:, 0:HIDDEN]
        k = qkv[:, HIDDEN:2 * HIDDEN]
        v = qkv[:, 2 * HIDDEN:3 * HIDDEN]
        ao_w = ao_w_ref[l]                                          # [H, H]

        # ---- multi-head attention; output projection accumulated per head ----
        attn = jnp.zeros((BATCH * SEQ, HIDDEN), jnp.float32)
        for h in range(NUM_HEADS):
            lo, hi = h * HEAD_DIM, (h + 1) * HEAD_DIM
            qh = q[:, lo:hi].reshape(BATCH, SEQ, HEAD_DIM)
            kh = k[:, lo:hi].reshape(BATCH, SEQ, HEAD_DIM)
            vh = v[:, lo:hi].reshape(BATCH, SEQ, HEAD_DIM)
            s = (jnp.einsum("bqd,bkd->bqk", qh, kh,
                            preferred_element_type=jnp.float32) * scale
                 + add_mask)                                        # [B, S, S]
            s = s - jnp.max(s, axis=-1, keepdims=True)
            p = jnp.exp(s)
            p = p * pl.reciprocal(jnp.sum(p, axis=-1, keepdims=True), approx=True)
            ch = jnp.einsum("bqk,bkd->bqd", p, vh,
                            preferred_element_type=jnp.float32)     # [B, S, D]
            # concat(ctx_heads) @ W_o  ==  sum_h ctx_h @ W_o[h*D:(h+1)*D, :]
            attn = attn + jnp.dot(ch.reshape(BATCH * SEQ, HEAD_DIM),
                                  ao_w[lo:hi, :],
                                  preferred_element_type=jnp.float32)
        attn = attn + ao_b_ref[l]
        x = _ln(x + attn, ln1_g_ref[l], ln1_b_ref[l])

        # ---- FFN ----
        hmid = (jnp.dot(x, i_w_ref[l], preferred_element_type=jnp.float32)
                + i_b_ref[l])
        # TODO(synk): HF RoBERTa uses exact (erf) GELU; tanh approximation used here.
        hmid = jax.nn.gelu(hmid, approximate=True)
        ff = (jnp.dot(hmid, fo_w_ref[l], preferred_element_type=jnp.float32)
              + fo_b_ref[l])
        x = _ln(x + ff, ln2_g_ref[l], ln2_b_ref[l])

    # ---- mean-pool over sequence + classifier head (fused epilogue) ----
    pooled = jnp.mean(x.reshape(BATCH, SEQ, HIDDEN), axis=1)        # [B, H]
    logits = (jnp.dot(pooled, fc_w_ref[...], preferred_element_type=jnp.float32)
              + fc_b_ref[...])
    o_ref[...] = logits.astype(o_ref.dtype)


# ------------------------------ parameter init ---------------------------------
def init_params(key):
    keys = iter(jax.random.split(key, 64))

    def nrm(shape):
        return (0.02 * jax.random.normal(next(keys), shape)).astype(jnp.float32)

    params = {
        "word_emb": nrm((VOCAB, HIDDEN)),
        "pos_emb": nrm((MAX_POS, HIDDEN)),
        "type_emb": nrm((1, HIDDEN)),
        "emb_ln_g": jnp.ones((1, HIDDEN), jnp.float32),
        "emb_ln_b": jnp.zeros((1, HIDDEN), jnp.float32),
        "fc_w": nrm((HIDDEN, NUM_CLASSES)),
        "fc_b": jnp.zeros((1, NUM_CLASSES), jnp.float32),
    }

    qkv_w, qkv_b = [], []
    ao_w, ao_b = [], []
    ln1_g, ln1_b = [], []
    i_w, i_b = [], []
    fo_w, fo_b = [], []
    ln2_g, ln2_b = [], []
    for _ in range(NUM_LAYERS):
        q_w, k_w, v_w = nrm((HIDDEN, HIDDEN)), nrm((HIDDEN, HIDDEN)), nrm((HIDDEN, HIDDEN))
        qkv_w.append(jnp.concatenate([q_w, k_w, v_w], axis=1))       # (H, 3H)
        qkv_b.append(jnp.zeros((1, 3 * HIDDEN), jnp.float32))
        ao_w.append(nrm((HIDDEN, HIDDEN)))
        ao_b.append(jnp.zeros((1, HIDDEN), jnp.float32))
        ln1_g.append(jnp.ones((1, HIDDEN), jnp.float32))
        ln1_b.append(jnp.zeros((1, HIDDEN), jnp.float32))
        i_w.append(nrm((HIDDEN, INTERMEDIATE)))
        i_b.append(jnp.zeros((1, INTERMEDIATE), jnp.float32))
        fo_w.append(nrm((INTERMEDIATE, HIDDEN)))
        fo_b.append(jnp.zeros((1, HIDDEN), jnp.float32))
        ln2_g.append(jnp.ones((1, HIDDEN), jnp.float32))
        ln2_b.append(jnp.zeros((1, HIDDEN), jnp.float32))

    stack = lambda xs: jnp.stack(xs, axis=0)
    params.update({
        "qkv_w": stack(qkv_w), "qkv_b": stack(qkv_b),
        "ao_w": stack(ao_w), "ao_b": stack(ao_b),
        "ln1_g": stack(ln1_g), "ln1_b": stack(ln1_b),
        "i_w": stack(i_w), "i_b": stack(i_b),
        "fo_w": stack(fo_w), "fo_b": stack(fo_b),
        "ln2_g": stack(ln2_g), "ln2_b": stack(ln2_b),
    })
    return params


# --------------------------------- forward -------------------------------------
@jax.jit
def webattack_classifier_forward(params, input_ids, attention_mask):
    """Mirrors WebAttack_Classfier.forward: RoBERTa -> output.mean(1) -> fc."""
    B, S = input_ids.shape

    # ---- embeddings (gathers are plain-JAX glue outside the kernel) ----
    mask_i = (input_ids != PAD_ID).astype(jnp.int32)
    position_ids = jnp.cumsum(mask_i, axis=1) * mask_i + PAD_ID      # RoBERTa-style positions
    token_type_ids = jnp.zeros((B, S), jnp.int32)
    emb = (jnp.take(params["word_emb"], input_ids, axis=0)
           + jnp.take(params["pos_emb"], position_ids, axis=0)
           + jnp.take(params["type_emb"], token_type_ids, axis=0)).astype(jnp.float32)
    emb = emb.reshape(B * S, HIDDEN)

    # ---- additive attention mask: [B, 1, S] ----
    neg = jnp.finfo(jnp.float32).min
    add_mask = (1.0 - attention_mask.astype(jnp.float32))[:, None, :] * neg

    vmem = pl.BlockSpec(memory_space=pltpu.MemorySpace.VMEM)
    logits = pl.pallas_call(
        _webattack_fused_kernel,
        out_shape=jax.ShapeDtypeStruct((B, NUM_CLASSES), jnp.float32),
        in_specs=[vmem] * 18,
        out_specs=vmem,
    )(
        emb, add_mask,
        params["emb_ln_g"], params["emb_ln_b"],
        params["qkv_w"], params["qkv_b"],
        params["ao_w"], params["ao_b"],
        params["ln1_g"], params["ln1_b"],
        params["i_w"], params["i_b"],
        params["fo_w"], params["fo_b"],
        params["ln2_g"], params["ln2_b"],
        params["fc_w"], params["fc_b"],
    )
    return logits


# ----------------------------------- main --------------------------------------
if __name__ == "__main__":
    key = jax.random.PRNGKey(0)
    pkey, dkey = jax.random.split(key)
    params = init_params(pkey)

    ids_key, _ = jax.random.split(dkey)
    input_ids = jax.random.randint(ids_key, (BATCH, SEQ), 2, VOCAB, dtype=jnp.int32)
    lengths = jnp.array([SEQ, SEQ - 3], dtype=jnp.int32)
    positions = jnp.arange(SEQ)[None, :]
    attention_mask = (positions < lengths[:, None]).astype(jnp.int32)
    input_ids = jnp.where(attention_mask == 1, input_ids, PAD_ID)

    logits = webattack_classifier_forward(params, input_ids, attention_mask)
    logits = jax.block_until_ready(logits)

    assert logits.shape == (BATCH, NUM_CLASSES), logits.shape
    assert bool(jnp.all(jnp.isfinite(logits)))
    print("KERNEL_OK")
</pallas_src>

<mosaic_0001>
module attributes {stable_mosaic.version = 11 : i64} {
  func.func @_webattack_fused_kernel(%arg0: memref<16x32xf32, #tpu.memory_space<vmem>>, %arg1: memref<2x1x8xf32, #tpu.memory_space<vmem>>, %arg2: memref<1x32xf32, #tpu.memory_space<vmem>>, %arg3: memref<1x32xf32, #tpu.memory_space<vmem>>, %arg4: memref<2x32x96xf32, #tpu.memory_space<vmem>>, %arg5: memref<2x1x96xf32, #tpu.memory_space<vmem>>, %arg6: memref<2x32x32xf32, #tpu.memory_space<vmem>>, %arg7: memref<2x1x32xf32, #tpu.memory_space<vmem>>, %arg8: memref<2x1x32xf32, #tpu.memory_space<vmem>>, %arg9: memref<2x1x32xf32, #tpu.memory_space<vmem>>, %arg10: memref<2x32x64xf32, #tpu.memory_space<vmem>>, %arg11: memref<2x1x64xf32, #tpu.memory_space<vmem>>, %arg12: memref<2x64x32xf32, #tpu.memory_space<vmem>>, %arg13: memref<2x1x32xf32, #tpu.memory_space<vmem>>, %arg14: memref<2x1x32xf32, #tpu.memory_space<vmem>>, %arg15: memref<2x1x32xf32, #tpu.memory_space<vmem>>, %arg16: memref<32x6xf32, #tpu.memory_space<vmem>>, %arg17: memref<1x6xf32, #tpu.memory_space<vmem>>, %arg18: memref<2x6xf32, #tpu.memory_space<vmem>>) attributes {dimension_semantics = [], scalar_prefetch = 0 : i64, scratch_operands = 0 : i64, tpu.core_type = #tpu.core_type<tc>} {
    %c0 = arith.constant 0 : index
    %c0_0 = arith.constant 0 : index
    %0 = vector.load %arg0[%c0, %c0_0] : memref<16x32xf32, #tpu.memory_space<vmem>>, vector<16x32xf32>
    %c0_1 = arith.constant 0 : index
    %c0_2 = arith.constant 0 : index
    %1 = vector.load %arg2[%c0_1, %c0_2] : memref<1x32xf32, #tpu.memory_space<vmem>>, vector<1x32xf32>
    %c0_3 = arith.constant 0 : index
    %c0_4 = arith.constant 0 : index
    %2 = vector.load %arg3[%c0_3, %c0_4] : memref<1x32xf32, #tpu.memory_space<vmem>>, vector<1x32xf32>
    %cst = arith.constant dense<0.000000e+00> : vector<16xf32>
    %3 = vector.multi_reduction <add>, %0, %cst [1] : vector<16x32xf32> to vector<16xf32>
    %4 = vector.shape_cast %3 : vector<16xf32> to vector<16x1xf32>
    %cst_5 = arith.constant 3.200000e+01 : f32
    %5 = vector.broadcast %cst_5 : f32 to vector<16x1xf32>
    %6 = arith.divf %4, %5 : vector<16x1xf32>
    %7 = vector.broadcast %6 : vector<16x1xf32> to vector<16x32xf32>
    %8 = arith.subf %0, %7 : vector<16x32xf32>
    %9 = arith.mulf %8, %8 : vector<16x32xf32>
    %cst_6 = arith.constant dense<0.000000e+00> : vector<16xf32>
    %10 = vector.multi_reduction <add>, %9, %cst_6 [1] : vector<16x32xf32> to vector<16xf32>
    %11 = vector.shape_cast %10 : vector<16xf32> to vector<16x1xf32>
    %cst_7 = arith.constant 3.200000e+01 : f32
    %12 = vector.broadcast %cst_7 : f32 to vector<16x1xf32>
    %13 = arith.divf %11, %12 : vector<16x1xf32>
    %14 = vector.broadcast %6 : vector<16x1xf32> to vector<16x32xf32>
    %15 = arith.subf %0, %14 : vector<16x32xf32>
    %cst_8 = arith.constant 9.99999974E-6 : f32
    %16 = vector.broadcast %cst_8 : f32 to vector<16x1xf32>
    %17 = arith.addf %13, %16 : vector<16x1xf32>
    %18 = math.rsqrt %17 : vector<16x1xf32>
    %19 = vector.broadcast %18 : vector<16x1xf32> to vector<16x32xf32>
    %20 = arith.mulf %15, %19 : vector<16x32xf32>
    %21 = vector.broadcast %1 : vector<1x32xf32> to vector<16x32xf32>
    %22 = arith.mulf %20, %21 : vector<16x32xf32>
    %23 = vector.broadcast %2 : vector<1x32xf32> to vector<16x32xf32>
    %24 = arith.addf %22, %23 : vector<16x32xf32>
    %c0_9 = arith.constant 0 : index
    %c0_10 = arith.constant 0 : index
    %c0_11 = arith.constant 0 : index
    %25 = vector.load %arg1[%c0_9, %c0_10, %c0_11] : memref<2x1x8xf32, #tpu.memory_space<vmem>>, vector<2x1x8xf32>
    %c0_12 = arith.constant 0 : index
    %c0_13 = arith.constant 0 : index
    %c0_14 = arith.constant 0 : index
    %26 = vector.load %arg4[%c0_12, %c0_13, %c0_14] : memref<2x32x96xf32, #tpu.memory_space<vmem>>, vector<1x32x96xf32>
    %27 = vector.shape_cast %26 : vector<1x32x96xf32> to vector<32x96xf32>
    %cst_15 = arith.constant dense<0.000000e+00> : vector<16x96xf32>
    %28 = tpu.matmul %24, %27, %cst_15 {dimension_numbers = #tpu.dot_dimension_numbers<[1], [0], [0], [1], [0, 0, 1, 1], [], []>} : vector<16x32xf32>, vector<32x96xf32>, vector<16x96xf32> -> vector<16x96xf32>
    %c0_16 = arith.constant 0 : index
    %c0_17 = arith.constant 0 : index
    %c0_18 = arith.constant 0 : index
    %29 = vector.load %arg5[%c0_16, %c0_17, %c0_18] : memref<2x1x96xf32, #tpu.memory_space<vmem>>, vector<1x1x96xf32>
    %30 = vector.shape_cast %29 : vector<1x1x96xf32> to vector<1x96xf32>
    %31 = vector.broadcast %30 : vector<1x96xf32> to vector<16x96xf32>
    %32 = arith.addf %28, %31 : vector<16x96xf32>
    %33 = vector.extract_strided_slice %32 {offsets = [0, 0], sizes = [16, 32], strides = [1, 1]} : vector<16x96xf32> to vector<16x32xf32>
    %34 = vector.extract_strided_slice %32 {offsets = [0, 32], sizes = [16, 32], strides = [1, 1]} : vector<16x96xf32> to vector<16x32xf32>
    %35 = vector.extract_strided_slice %32 {offsets = [0, 64], sizes = [16, 32], strides = [1, 1]} : vector<16x96xf32> to vector<16x32xf32>
    %c0_19 = arith.constant 0 : index
    %c0_20 = arith.constant 0 : index
    %c0_21 = arith.constant 0 : index
    %36 = vector.load %arg6[%c0_19, %c0_20, %c0_21] : memref<2x32x32xf32, #tpu.memory_space<vmem>>, vector<1x32x32xf32>
    %37 = vector.shape_cast %36 : vector<1x32x32xf32> to vector<32x32xf32>
    %cst_22 = arith.constant 0.000000e+00 : f32
    %38 = vector.broadcast %cst_22 : f32 to vector<16x32xf32>
    %39 = vector.extract_strided_slice %33 {offsets = [0, 0], sizes = [16, 8], strides = [1, 1]} : vector<16x32xf32> to vector<16x8xf32>
    %40 = vector.shape_cast %39 : vector<16x8xf32> to vector<2x8x8xf32>
    %41 = vector.extract_strided_slice %34 {offsets = [0, 0], sizes = [16, 8], strides = [1, 1]} : vector<16x32xf32> to vector<16x8xf32>
    %42 = vector.shape_cast %41 : vector<16x8xf32> to vector<2x8x8xf32>
    %43 = vector.extract_strided_slice %35 {offsets = [0, 0], sizes = [16, 8], strides = [1, 1]} : vector<16x32xf32> to vector<16x8xf32>
    %44 = vector.shape_cast %43 : vector<16x8xf32> to vector<2x8x8xf32>
    "tpu.trace_start"() <{level = 10 : i32, message = "bqd,bkd->bqk"}> : () -> ()
    %cst_23 = arith.constant dense<0.000000e+00> : vector<2x8x8xf32>
    %45 = tpu.matmul %40, %42, %cst_23 {dimension_numbers = #tpu.dot_dimension_numbers<[2], [2], [1], [1], [0, 0, 0, 1, 1, 1], [0], [0]>} : vector<2x8x8xf32>, vector<2x8x8xf32>, vector<2x8x8xf32> -> vector<2x8x8xf32>
    "tpu.trace_stop"() : () -> ()
    %cst_24 = arith.constant 0.353553385 : f32
    %46 = vector.broadcast %cst_24 : f32 to vector<2x8x8xf32>
    %47 = arith.mulf %45, %46 : vector<2x8x8xf32>
    %48 = vector.broadcast %25 : vector<2x1x8xf32> to vector<2x8x8xf32>
    %49 = arith.addf %47, %48 : vector<2x8x8xf32>
    %cst_25 = arith.constant dense<0xFF800000> : vector<2x8xf32>
    %50 = vector.multi_reduction <maximumf>, %49, %cst_25 [2] : vector<2x8x8xf32> to vector<2x8xf32>
    %51 = vector.shape_cast %50 : vector<2x8xf32> to vector<2x8x1xf32>
    %52 = vector.broadcast %51 : vector<2x8x1xf32> to vector<2x8x8xf32>
    %53 = arith.subf %49, %52 : vector<2x8x8xf32>
    %54 = math.exp %53 : vector<2x8x8xf32>
    %cst_26 = arith.constant dense<0.000000e+00> : vector<2x8xf32>
    %55 = vector.multi_reduction <add>, %54, %cst_26 [2] : vector<2x8x8xf32> to vector<2x8xf32>
    %56 = vector.shape_cast %55 : vector<2x8xf32> to vector<2x8x1xf32>
    %57 = tpu.reciprocal %56 {approx = true} : vector<2x8x1xf32> -> vector<2x8x1xf32>
    %58 = vector.broadcast %57 : vector<2x8x1xf32> to vector<2x8x8xf32>
    %59 = arith.mulf %54, %58 : vector<2x8x8xf32>
    "tpu.trace_start"() <{level = 10 : i32, message = "bqk,bkd->bqd"}> : () -> ()
    %cst_27 = arith.constant dense<0.000000e+00> : vector<2x8x8xf32>
    %60 = tpu.matmul %59, %44, %cst_27 {dimension_numbers = #tpu.dot_dimension_numbers<[2], [1], [1], [2], [0, 0, 0, 1, 1, 2], [0], [0]>} : vector<2x8x8xf32>, vector<2x8x8xf32>, vector<2x8x8xf32> -> vector<2x8x8xf32>
    "tpu.trace_stop"() : () -> ()
    %61 = vector.shape_cast %60 : vector<2x8x8xf32> to vector<16x8xf32>
    %62 = vector.extract_strided_slice %37 {offsets = [0, 0], sizes = [8, 32], strides = [1, 1]} : vector<32x32xf32> to vector<8x32xf32>
    %cst_28 = arith.constant dense<0.000000e+00> : vector<16x32xf32>
    %63 = tpu.matmul %61, %62, %cst_28 {dimension_numbers = #tpu.dot_dimension_numbers<[1], [0], [0], [1], [0, 0, 1, 1], [], []>} : vector<16x8xf32>, vector<8x32xf32>, vector<16x32xf32> -> vector<16x32xf32>
    %64 = arith.addf %38, %63 : vector<16x32xf32>
    %65 = vector.extract_strided_slice %33 {offsets = [0, 8], sizes = [16, 8], strides = [1, 1]} : vector<16x32xf32> to vector<16x8xf32>
    %66 = vector.shape_cast %65 : vector<16x8xf32> to vector<2x8x8xf32>
    %67 = vector.extract_strided_slice %34 {offsets = [0, 8], sizes = [16, 8], strides = [1, 1]} : vector<16x32xf32> to vector<16x8xf32>
    %68 = vector.shape_cast %67 : vector<16x8xf32> to vector<2x8x8xf32>
    %69 = vector.extract_strided_slice %35 {offsets = [0, 8], sizes = [16, 8], strides = [1, 1]} : vector<16x32xf32> to vector<16x8xf32>
    %70 = vector.shape_cast %69 : vector<16x8xf32> to vector<2x8x8xf32>
    "tpu.trace_start"() <{level = 10 : i32, message = "bqd,bkd->bqk"}> : () -> ()
    %cst_29 = arith.constant dense<0.000000e+00> : vector<2x8x8xf32>
    %71 = tpu.matmul %66, %68, %cst_29 {dimension_numbers = #tpu.dot_dimension_numbers<[2], [2], [1], [1], [0, 0, 0, 1, 1, 1], [0], [0]>} : vector<2x8x8xf32>, vector<2x8x8xf32>, vector<2x8x8xf32> -> vector<2x8x8xf32>
    "tpu.trace_stop"() : () -> ()
    %cst_30 = arith.constant 0.353553385 : f32
    %72 = vector.broadcast %cst_30 : f32 to vector<2x8x8xf32>
    %73 = arith.mulf %71, %72 : vector<2x8x8xf32>
    %74 = vector.broadcast %25 : vector<2x1x8xf32> to vector<2x8x8xf32>
    %75 = arith.addf %73, %74 : vector<2x8x8xf32>
    %cst_31 = arith.constant dense<0xFF800000> : vector<2x8xf32>
    %76 = vector.multi_reduction <maximumf>, %75, %cst_31 [2] : vector<2x8x8xf32> to vector<2x8xf32>
    %77 = vector.shape_cast %76 : vector<2x8xf32> to vector<2x8x1xf32>
    %78 = vector.broadcast %77 : vector<2x8x1xf32> to vector<2x8x8xf32>
    %79 = arith.subf %75, %78 : vector<2x8x8xf32>
    %80 = math.exp %79 : vector<2x8x8xf32>
    %cst_32 = arith.constant dense<0.000000e+00> : vector<2x8xf32>
    %81 = vector.multi_reduction <add>, %80, %cst_32 [2] : vector<2x8x8xf32> to vector<2x8xf32>
    %82 = vector.shape_cast %81 : vector<2x8xf32> to vector<2x8x1xf32>
    %83 = tpu.reciprocal %82 {approx = true} : vector<2x8x1xf32> -> vector<2x8x1xf32>
    %84 = vector.broadcast %83 : vector<2x8x1xf32> to vector<2x8x8xf32>
    %85 = arith.mulf %80, %84 : vector<2x8x8xf32>
    "tpu.trace_start"() <{level = 10 : i32, message = "bqk,bkd->bqd"}> : () -> ()
    %cst_33 = arith.constant dense<0.000000e+00> : vector<2x8x8xf32>
    %86 = tpu.matmul %85, %70, %cst_33 {dimension_numbers = #tpu.dot_dimension_numbers<[2], [1], [1], [2], [0, 0, 0, 1, 1, 2], [0], [0]>} : vector<2x8x8xf32>, vector<2x8x8xf32>, vector<2x8x8xf32> -> vector<2x8x8xf32>
    "tpu.trace_stop"() : () -> ()
    %87 = vector.shape_cast %86 : vector<2x8x8xf32> to vector<16x8xf32>
    %88 = vector.extract_strided_slice %37 {offsets = [8, 0], sizes = [8, 32], strides = [1, 1]} : vector<32x32xf32> to vector<8x32xf32>
    %cst_34 = arith.constant dense<0.000000e+00> : vector<16x32xf32>
    %89 = tpu.matmul %87, %88, %cst_34 {dimension_numbers = #tpu.dot_dimension_numbers<[1], [0], [0], [1], [0, 0, 1, 1], [], []>} : vector<16x8xf32>, vector<8x32xf32>, vector<16x32xf32> -> vector<16x32xf32>
    %90 = arith.addf %64, %89 : vector<16x32xf32>
    %91 = vector.extract_strided_slice %33 {offsets = [0, 16], sizes = [16, 8], strides = [1, 1]} : vector<16x32xf32> to vector<16x8xf32>
    %92 = vector.shape_cast %91 : vector<16x8xf32> to vector<2x8x8xf32>
    %93 = vector.extract_strided_slice %34 {offsets = [0, 16], sizes = [16, 8], strides = [1, 1]} : vector<16x32xf32> to vector<16x8xf32>
    %94 = vector.shape_cast %93 : vector<16x8xf32> to vector<2x8x8xf32>
    %95 = vector.extract_strided_slice %35 {offsets = [0, 16], sizes = [16, 8], strides = [1, 1]} : vector<16x32xf32> to vector<16x8xf32>
    %96 = vector.shape_cast %95 : vector<16x8xf32> to vector<2x8x8xf32>
    "tpu.trace_start"() <{level = 10 : i32, message = "bqd,bkd->bqk"}> : () -> ()
    %cst_35 = arith.constant dense<0.000000e+00> : vector<2x8x8xf32>
    %97 = tpu.matmul %92, %94, %cst_35 {dimension_numbers = #tpu.dot_dimension_numbers<[2], [2], [1], [1], [0, 0, 0, 1, 1, 1], [0], [0]>} : vector<2x8x8xf32>, vector<2x8x8xf32>, vector<2x8x8xf32> -> vector<2x8x8xf32>
    "tpu.trace_stop"() : () -> ()
    %cst_36 = arith.constant 0.353553385 : f32
    %98 = vector.broadcast %cst_36 : f32 to vector<2x8x8xf32>
    %99 = arith.mulf %97, %98 : vector<2x8x8xf32>
    %100 = vector.broadcast %25 : vector<2x1x8xf32> to vector<2x8x8xf32>
    %101 = arith.addf %99, %100 : vector<2x8x8xf32>
    %cst_37 = arith.constant dense<0xFF800000> : vector<2x8xf32>
    %102 = vector.multi_reduction <maximumf>, %101, %cst_37 [2] : vector<2x8x8xf32> to vector<2x8xf32>
    %103 = vector.shape_cast %102 : vector<2x8xf32> to vector<2x8x1xf32>
    %104 = vector.broadcast %103 : vector<2x8x1xf32> to vector<2x8x8xf32>
    %105 = arith.subf %101, %104 : vector<2x8x8xf32>
    %106 = math.exp %105 : vector<2x8x8xf32>
    %cst_38 = arith.constant dense<0.000000e+00> : vector<2x8xf32>
    %107 = vector.multi_reduction <add>, %106, %cst_38 [2] : vector<2x8x8xf32> to vector<2x8xf32>
    %108 = vector.shape_cast %107 : vector<2x8xf32> to vector<2x8x1xf32>
    %109 = tpu.reciprocal %108 {approx = true} : vector<2x8x1xf32> -> vector<2x8x1xf32>
    %110 = vector.broadcast %109 : vector<2x8x1xf32> to vector<2x8x8xf32>
    %111 = arith.mulf %106, %110 : vector<2x8x8xf32>
    "tpu.trace_start"() <{level = 10 : i32, message = "bqk,bkd->bqd"}> : () -> ()
    %cst_39 = arith.constant dense<0.000000e+00> : vector<2x8x8xf32>
    %112 = tpu.matmul %111, %96, %cst_39 {dimension_numbers = #tpu.dot_dimension_numbers<[2], [1], [1], [2], [0, 0, 0, 1, 1, 2], [0], [0]>} : vector<2x8x8xf32>, vector<2x8x8xf32>, vector<2x8x8xf32> -> vector<2x8x8xf32>
    "tpu.trace_stop"() : () -> ()
    %113 = vector.shape_cast %112 : vector<2x8x8xf32> to vector<16x8xf32>
    %114 = vector.extract_strided_slice %37 {offsets = [16, 0], sizes = [8, 32], strides = [1, 1]} : vector<32x32xf32> to vector<8x32xf32>
    %cst_40 = arith.constant dense<0.000000e+00> : vector<16x32xf32>
    %115 = tpu.matmul %113, %114, %cst_40 {dimension_numbers = #tpu.dot_dimension_numbers<[1], [0], [0], [1], [0, 0, 1, 1], [], []>} : vector<16x8xf32>, vector<8x32xf32>, vector<16x32xf32> -> vector<16x32xf32>
    %116 = arith.addf %90, %115 : vector<16x32xf32>
    %117 = vector.extract_strided_slice %33 {offsets = [0, 24], sizes = [16, 8], strides = [1, 1]} : vector<16x32xf32> to vector<16x8xf32>
    %118 = vector.shape_cast %117 : vector<16x8xf32> to vector<2x8x8xf32>
    %119 = vector.extract_strided_slice %34 {offsets = [0, 24], sizes = [16, 8], strides = [1, 1]} : vector<16x32xf32> to vector<16x8xf32>
    %120 = vector.shape_cast %119 : vector<16x8xf32> to vector<2x8x8xf32>
    %121 = vector.extract_strided_slice %35 {offsets = [0, 24], sizes = [16, 8], strides = [1, 1]} : vector<16x32xf32> to vector<16x8xf32>
    %122 = vector.shape_cast %121 : vector<16x8xf32> to vector<2x8x8xf32>
    "tpu.trace_start"() <{level = 10 : i32, message = "bqd,bkd->bqk"}> : () -> ()
    %cst_41 = arith.constant dense<0.000000e+00> : vector<2x8x8xf32>
    %123 = tpu.matmul %118, %120, %cst_41 {dimension_numbers = #tpu.dot_dimension_numbers<[2], [2], [1], [1], [0, 0, 0, 1, 1, 1], [0], [0]>} : vector<2x8x8xf32>, vector<2x8x8xf32>, vector<2x8x8xf32> -> vector<2x8x8xf32>
    "tpu.trace_stop"() : () -> ()
    %cst_42 = arith.constant 0.353553385 : f32
    %124 = vector.broadcast %cst_42 : f32 to vector<2x8x8xf32>
    %125 = arith.mulf %123, %124 : vector<2x8x8xf32>
    %126 = vector.broadcast %25 : vector<2x1x8xf32> to vector<2x8x8xf32>
    %127 = arith.addf %125, %126 : vector<2x8x8xf32>
    %cst_43 = arith.constant dense<0xFF800000> : vector<2x8xf32>
    %128 = vector.multi_reduction <maximumf>, %127, %cst_43 [2] : vector<2x8x8xf32> to vector<2x8xf32>
    %129 = vector.shape_cast %128 : vector<2x8xf32> to vector<2x8x1xf32>
    %130 = vector.broadcast %129 : vector<2x8x1xf32> to vector<2x8x8xf32>
    %131 = arith.subf %127, %130 : vector<2x8x8xf32>
    %132 = math.exp %131 : vector<2x8x8xf32>
    %cst_44 = arith.constant dense<0.000000e+00> : vector<2x8xf32>
    %133 = vector.multi_reduction <add>, %132, %cst_44 [2] : vector<2x8x8xf32> to vector<2x8xf32>
    %134 = vector.shape_cast %133 : vector<2x8xf32> to vector<2x8x1xf32>
    %135 = tpu.reciprocal %134 {approx = true} : vector<2x8x1xf32> -> vector<2x8x1xf32>
    %136 = vector.broadcast %135 : vector<2x8x1xf32> to vector<2x8x8xf32>
    %137 = arith.mulf %132, %136 : vector<2x8x8xf32>
    "tpu.trace_start"() <{level = 10 : i32, message = "bqk,bkd->bqd"}> : () -> ()
    %cst_45 = arith.constant dense<0.000000e+00> : vector<2x8x8xf32>
    %138 = tpu.matmul %137, %122, %cst_45 {dimension_numbers = #tpu.dot_dimension_numbers<[2], [1], [1], [2], [0, 0, 0, 1, 1, 2], [0], [0]>} : vector<2x8x8xf32>, vector<2x8x8xf32>, vector<2x8x8xf32> -> vector<2x8x8xf32>
    "tpu.trace_stop"() : () -> ()
    %139 = vector.shape_cast %138 : vector<2x8x8xf32> to vector<16x8xf32>
    %140 = vector.extract_strided_slice %37 {offsets = [24, 0], sizes = [8, 32], strides = [1, 1]} : vector<32x32xf32> to vector<8x32xf32>
    %cst_46 = arith.constant dense<0.000000e+00> : vector<16x32xf32>
    %141 = tpu.matmul %139, %140, %cst_46 {dimension_numbers = #tpu.dot_dimension_numbers<[1], [0], [0], [1], [0, 0, 1, 1], [], []>} : vector<16x8xf32>, vector<8x32xf32>, vector<16x32xf32> -> vector<16x32xf32>
    %142 = arith.addf %116, %141 : vector<16x32xf32>
    %c0_47 = arith.constant 0 : index
    %c0_48 = arith.constant 0 : index
    %c0_49 = arith.constant 0 : index
    %143 = vector.load %arg7[%c0_47, %c0_48, %c0_49] : memref<2x1x32xf32, #tpu.memory_space<vmem>>, vector<1x1x32xf32>
    %144 = vector.shape_cast %143 : vector<1x1x32xf32> to vector<1x32xf32>
    %145 = vector.broadcast %144 : vector<1x32xf32> to vector<16x32xf32>
    %146 = arith.addf %142, %145 : vector<16x32xf32>
    %147 = arith.addf %24, %146 : vector<16x32xf32>
    %c0_50 = arith.constant 0 : index
    %c0_51 = arith.constant 0 : index
    %c0_52 = arith.constant 0 : index
    %148 = vector.load %arg8[%c0_50, %c0_51, %c0_52] : memref<2x1x32xf32, #tpu.memory_space<vmem>>, vector<1x1x32xf32>
    %149 = vector.shape_cast %148 : vector<1x1x32xf32> to vector<1x32xf32>
    %c0_53 = arith.constant 0 : index
    %c0_54 = arith.constant 0 : index
    %c0_55 = arith.constant 0 : index
    %150 = vector.load %arg9[%c0_53, %c0_54, %c0_55] : memref<2x1x32xf32, #tpu.memory_space<vmem>>, vector<1x1x32xf32>
    %151 = vector.shape_cast %150 : vector<1x1x32xf32> to vector<1x32xf32>
    %cst_56 = arith.constant dense<0.000000e+00> : vector<16xf32>
    %152 = vector.multi_reduction <add>, %147, %cst_56 [1] : vector<16x32xf32> to vector<16xf32>
    %153 = vector.shape_cast %152 : vector<16xf32> to vector<16x1xf32>
    %cst_57 = arith.constant 3.200000e+01 : f32
    %154 = vector.broadcast %cst_57 : f32 to vector<16x1xf32>
    %155 = arith.divf %153, %154 : vector<16x1xf32>
    %156 = vector.broadcast %155 : vector<16x1xf32> to vector<16x32xf32>
    %157 = arith.subf %147, %156 : vector<16x32xf32>
    %158 = arith.mulf %157, %157 : vector<16x32xf32>
    %cst_58 = arith.constant dense<0.000000e+00> : vector<16xf32>
    %159 = vector.multi_reduction <add>, %158, %cst_58 [1] : vector<16x32xf32> to vector<16xf32>
    %160 = vector.shape_cast %159 : vector<16xf32> to vector<16x1xf32>
    %cst_59 = arith.constant 3.200000e+01 : f32
    %161 = vector.broadcast %cst_59 : f32 to vector<16x1xf32>
    %162 = arith.divf %160, %161 : vector<16x1xf32>
    %163 = vector.broadcast %155 : vector<16x1xf32> to vector<16x32xf32>
    %164 = arith.subf %147, %163 : vector<16x32xf32>
    %cst_60 = arith.constant 9.99999974E-6 : f32
    %165 = vector.broadcast %cst_60 : f32 to vector<16x1xf32>
    %166 = arith.addf %162, %165 : vector<16x1xf32>
    %167 = math.rsqrt %166 : vector<16x1xf32>
    %168 = vector.broadcast %167 : vector<16x1xf32> to vector<16x32xf32>
    %169 = arith.mulf %164, %168 : vector<16x32xf32>
    %170 = vector.broadcast %149 : vector<1x32xf32> to vector<16x32xf32>
    %171 = arith.mulf %169, %170 : vector<16x32xf32>
    %172 = vector.broadcast %151 : vector<1x32xf32> to vector<16x32xf32>
    %173 = arith.addf %171, %172 : vector<16x32xf32>
    %c0_61 = arith.constant 0 : index
    %c0_62 = arith.constant 0 : index
    %c0_63 = arith.constant 0 : index
    %174 = vector.load %arg10[%c0_61, %c0_62, %c0_63] : memref<2x32x64xf32, #tpu.memory_space<vmem>>, vector<1x32x64xf32>
    %175 = vector.shape_cast %174 : vector<1x32x64xf32> to vector<32x64xf32>
    %cst_64 = arith.constant dense<0.000000e+00> : vector<16x64xf32>
    %176 = tpu.matmul %173, %175, %cst_64 {dimension_numbers = #tpu.dot_dimension_numbers<[1], [0], [0], [1], [0, 0, 1, 1], [], []>} : vector<16x32xf32>, vector<32x64xf32>, vector<16x64xf32> -> vector<16x64xf32>
    %c0_65 = arith.constant 0 : index
    %c0_66 = arith.constant 0 : index
    %c0_67 = arith.constant 0 : index
    %177 = vector.load %arg11[%c0_65, %c0_66, %c0_67] : memref<2x1x64xf32, #tpu.memory_space<vmem>>, vector<1x1x64xf32>
    %178 = vector.shape_cast %177 : vector<1x1x64xf32> to vector<1x64xf32>
    %179 = vector.broadcast %178 : vector<1x64xf32> to vector<16x64xf32>
    %180 = arith.addf %176, %179 : vector<16x64xf32>
    %181 = arith.mulf %180, %180 : vector<16x64xf32>
    %182 = arith.mulf %180, %181 : vector<16x64xf32>
    %cst_68 = arith.constant 4.471500e-02 : f32
    %183 = vector.broadcast %cst_68 : f32 to vector<16x64xf32>
    %184 = arith.mulf %183, %182 : vector<16x64xf32>
    %185 = arith.addf %180, %184 : vector<16x64xf32>
    %cst_69 = arith.constant 0.797884583 : f32
    %186 = vector.broadcast %cst_69 : f32 to vector<16x64xf32>
    %187 = arith.mulf %186, %185 : vector<16x64xf32>
    %188 = math.tanh %187 : vector<16x64xf32>
    %cst_70 = arith.constant 1.000000e+00 : f32
    %189 = vector.broadcast %cst_70 : f32 to vector<16x64xf32>
    %190 = arith.addf %189, %188 : vector<16x64xf32>
    %cst_71 = arith.constant 5.000000e-01 : f32
    %191 = vector.broadcast %cst_71 : f32 to vector<16x64xf32>
    %192 = arith.mulf %191, %190 : vector<16x64xf32>
    %193 = arith.mulf %180, %192 : vector<16x64xf32>
    %c0_72 = arith.constant 0 : index
    %c0_73 = arith.constant 0 : index
    %c0_74 = arith.constant 0 : index
    %194 = vector.load %arg12[%c0_72, %c0_73, %c0_74] : memref<2x64x32xf32, #tpu.memory_space<vmem>>, vector<1x64x32xf32>
    %195 = vector.shape_cast %194 : vector<1x64x32xf32> to vector<64x32xf32>
    %cst_75 = arith.constant dense<0.000000e+00> : vector<16x32xf32>
    %196 = tpu.matmul %193, %195, %cst_75 {dimension_numbers = #tpu.dot_dimension_numbers<[1], [0], [0], [1], [0, 0, 1, 1], [], []>} : vector<16x64xf32>, vector<64x32xf32>, vector<16x32xf32> -> vector<16x32xf32>
    %c0_76 = arith.constant 0 : index
    %c0_77 = arith.constant 0 : index
    %c0_78 = arith.constant 0 : index
    %197 = vector.load %arg13[%c0_76, %c0_77, %c0_78] : memref<2x1x32xf32, #tpu.memory_space<vmem>>, vector<1x1x32xf32>
    %198 = vector.shape_cast %197 : vector<1x1x32xf32> to vector<1x32xf32>
    %199 = vector.broadcast %198 : vector<1x32xf32> to vector<16x32xf32>
    %200 = arith.addf %196, %199 : vector<16x32xf32>
    %201 = arith.addf %173, %200 : vector<16x32xf32>
    %c0_79 = arith.constant 0 : index
    %c0_80 = arith.constant 0 : index
    %c0_81 = arith.constant 0 : index
    %202 = vector.load %arg14[%c0_79, %c0_80, %c0_81] : memref<2x1x32xf32, #tpu.memory_space<vmem>>, vector<1x1x32xf32>
    %203 = vector.shape_cast %202 : vector<1x1x32xf32> to vector<1x32xf32>
    %c0_82 = arith.constant 0 : index
    %c0_83 = arith.constant 0 : index
    %c0_84 = arith.constant 0 : index
    %204 = vector.load %arg15[%c0_82, %c0_83, %c0_84] : memref<2x1x32xf32, #tpu.memory_space<vmem>>, vector<1x1x32xf32>
    %205 = vector.shape_cast %204 : vector<1x1x32xf32> to vector<1x32xf32>
    %cst_85 = arith.constant dense<0.000000e+00> : vector<16xf32>
    %206 = vector.multi_reduction <add>, %201, %cst_85 [1] : vector<16x32xf32> to vector<16xf32>
    %207 = vector.shape_cast %206 : vector<16xf32> to vector<16x1xf32>
    %cst_86 = arith.constant 3.200000e+01 : f32
    %208 = vector.broadcast %cst_86 : f32 to vector<16x1xf32>
    %209 = arith.divf %207, %208 : vector<16x1xf32>
    %210 = vector.broadcast %209 : vector<16x1xf32> to vector<16x32xf32>
    %211 = arith.subf %201, %210 : vector<16x32xf32>
    %212 = arith.mulf %211, %211 : vector<16x32xf32>
    %cst_87 = arith.constant dense<0.000000e+00> : vector<16xf32>
    %213 = vector.multi_reduction <add>, %212, %cst_87 [1] : vector<16x32xf32> to vector<16xf32>
    %214 = vector.shape_cast %213 : vector<16xf32> to vector<16x1xf32>
    %cst_88 = arith.constant 3.200000e+01 : f32
    %215 = vector.broadcast %cst_88 : f32 to vector<16x1xf32>
    %216 = arith.divf %214, %215 : vector<16x1xf32>
    %217 = vector.broadcast %209 : vector<16x1xf32> to vector<16x32xf32>
    %218 = arith.subf %201, %217 : vector<16x32xf32>
    %cst_89 = arith.constant 9.99999974E-6 : f32
    %219 = vector.broadcast %cst_89 : f32 to vector<16x1xf32>
    %220 = arith.addf %216, %219 : vector<16x1xf32>
    %221 = math.rsqrt %220 : vector<16x1xf32>
    %222 = vector.broadcast %221 : vector<16x1xf32> to vector<16x32xf32>
    %223 = arith.mulf %218, %222 : vector<16x32xf32>
    %224 = vector.broadcast %203 : vector<1x32xf32> to vector<16x32xf32>
    %225 = arith.mulf %223, %224 : vector<16x32xf32>
    %226 = vector.broadcast %205 : vector<1x32xf32> to vector<16x32xf32>
    %227 = arith.addf %225, %226 : vector<16x32xf32>
    %c1 = arith.constant 1 : index
    %c0_90 = arith.constant 0 : index
    %c0_91 = arith.constant 0 : index
    %228 = vector.load %arg4[%c1, %c0_90, %c0_91] : memref<2x32x96xf32, #tpu.memory_space<vmem>>, vector<1x32x96xf32>
    %229 = vector.shape_cast %228 : vector<1x32x96xf32> to vector<32x96xf32>
    %cst_92 = arith.constant dense<0.000000e+00> : vector<16x96xf32>
    %230 = tpu.matmul %227, %229, %cst_92 {dimension_numbers = #tpu.dot_dimension_numbers<[1], [0], [0], [1], [0, 0, 1, 1], [], []>} : vector<16x32xf32>, vector<32x96xf32>, vector<16x96xf32> -> vector<16x96xf32>
    %c1_93 = arith.constant 1 : index
    %c0_94 = arith.constant 0 : index
    %c0_95 = arith.constant 0 : index
    %231 = vector.load %arg5[%c1_93, %c0_94, %c0_95] : memref<2x1x96xf32, #tpu.memory_space<vmem>>, vector<1x1x96xf32>
    %232 = vector.shape_cast %231 : vector<1x1x96xf32> to vector<1x96xf32>
    %233 = vector.broadcast %232 : vector<1x96xf32> to vector<16x96xf32>
    %234 = arith.addf %230, %233 : vector<16x96xf32>
    %235 = vector.extract_strided_slice %234 {offsets = [0, 0], sizes = [16, 32], strides = [1, 1]} : vector<16x96xf32> to vector<16x32xf32>
    %236 = vector.extract_strided_slice %234 {offsets = [0, 32], sizes = [16, 32], strides = [1, 1]} : vector<16x96xf32> to vector<16x32xf32>
    %237 = vector.extract_strided_slice %234 {offsets = [0, 64], sizes = [16, 32], strides = [1, 1]} : vector<16x96xf32> to vector<16x32xf32>
    %c1_96 = arith.constant 1 : index
    %c0_97 = arith.constant 0 : index
    %c0_98 = arith.constant 0 : index
    %238 = vector.load %arg6[%c1_96, %c0_97, %c0_98] : memref<2x32x32xf32, #tpu.memory_space<vmem>>, vector<1x32x32xf32>
    %239 = vector.shape_cast %238 : vector<1x32x32xf32> to vector<32x32xf32>
    %cst_99 = arith.constant 0.000000e+00 : f32
    %240 = vector.broadcast %cst_99 : f32 to vector<16x32xf32>
    %241 = vector.extract_strided_slice %235 {offsets = [0, 0], sizes = [16, 8], strides = [1, 1]} : vector<16x32xf32> to vector<16x8xf32>
    %242 = vector.shape_cast %241 : vector<16x8xf32> to vector<2x8x8xf32>
    %243 = vector.extract_strided_slice %236 {offsets = [0, 0], sizes = [16, 8], strides = [1, 1]} : vector<16x32xf32> to vector<16x8xf32>
    %244 = vector.shape_cast %243 : vector<16x8xf32> to vector<2x8x8xf32>
    %245 = vector.extract_strided_slice %237 {offsets = [0, 0], sizes = [16, 8], strides = [1, 1]} : vector<16x32xf32> to vector<16x8xf32>
    %246 = vector.shape_cast %245 : vector<16x8xf32> to vector<2x8x8xf32>
    "tpu.trace_start"() <{level = 10 : i32, message = "bqd,bkd->bqk"}> : () -> ()
    %cst_100 = arith.constant dense<0.000000e+00> : vector<2x8x8xf32>
    %247 = tpu.matmul %242, %244, %cst_100 {dimension_numbers = #tpu.dot_dimension_numbers<[2], [2], [1], [1], [0, 0, 0, 1, 1, 1], [0], [0]>} : vector<2x8x8xf32>, vector<2x8x8xf32>, vector<2x8x8xf32> -> vector<2x8x8xf32>
    "tpu.trace_stop"() : () -> ()
    %cst_101 = arith.constant 0.353553385 : f32
    %248 = vector.broadcast %cst_101 : f32 to vector<2x8x8xf32>
    %249 = arith.mulf %247, %248 : vector<2x8x8xf32>
    %250 = vector.broadcast %25 : vector<2x1x8xf32> to vector<2x8x8xf32>
    %251 = arith.addf %249, %250 : vector<2x8x8xf32>
    %cst_102 = arith.constant dense<0xFF800000> : vector<2x8xf32>
    %252 = vector.multi_reduction <maximumf>, %251, %cst_102 [2] : vector<2x8x8xf32> to vector<2x8xf32>
    %253 = vector.shape_cast %252 : vector<2x8xf32> to vector<2x8x1xf32>
    %254 = vector.broadcast %253 : vector<2x8x1xf32> to vector<2x8x8xf32>
    %255 = arith.subf %251, %254 : vector<2x8x8xf32>
    %256 = math.exp %255 : vector<2x8x8xf32>
    %cst_103 = arith.constant dense<0.000000e+00> : vector<2x8xf32>
    %257 = vector.multi_reduction <add>, %256, %cst_103 [2] : vector<2x8x8xf32> to vector<2x8xf32>
    %258 = vector.shape_cast %257 : vector<2x8xf32> to vector<2x8x1xf32>
    %259 = tpu.reciprocal %258 {approx = true} : vector<2x8x1xf32> -> vector<2x8x1xf32>
    %260 = vector.broadcast %259 : vector<2x8x1xf32> to vector<2x8x8xf32>
    %261 = arith.mulf %256, %260 : vector<2x8x8xf32>
    "tpu.trace_start"() <{level = 10 : i32, message = "bqk,bkd->bqd"}> : () -> ()
    %cst_104 = arith.constant dense<0.000000e+00> : vector<2x8x8xf32>
    %262 = tpu.matmul %261, %246, %cst_104 {dimension_numbers = #tpu.dot_dimension_numbers<[2], [1], [1], [2], [0, 0, 0, 1, 1, 2], [0], [0]>} : vector<2x8x8xf32>, vector<2x8x8xf32>, vector<2x8x8xf32> -> vector<2x8x8xf32>
    "tpu.trace_stop"() : () -> ()
    %263 = vector.shape_cast %262 : vector<2x8x8xf32> to vector<16x8xf32>
    %264 = vector.extract_strided_slice %239 {offsets = [0, 0], sizes = [8, 32], strides = [1, 1]} : vector<32x32xf32> to vector<8x32xf32>
    %cst_105 = arith.constant dense<0.000000e+00> : vector<16x32xf32>
    %265 = tpu.matmul %263, %264, %cst_105 {dimension_numbers = #tpu.dot_dimension_numbers<[1], [0], [0], [1], [0, 0, 1, 1], [], []>} : vector<16x8xf32>, vector<8x32xf32>, vector<16x32xf32> -> vector<16x32xf32>
    %266 = arith.addf %240, %265 : vector<16x32xf32>
    %267 = vector.extract_strided_slice %235 {offsets = [0, 8], sizes = [16, 8], strides = [1, 1]} : vector<16x32xf32> to vector<16x8xf32>
    %268 = vector.shape_cast %267 : vector<16x8xf32> to vector<2x8x8xf32>
    %269 = vector.extract_strided_slice %236 {offsets = [0, 8], sizes = [16, 8], strides = [1, 1]} : vector<16x32xf32> to vector<16x8xf32>
    %270 = vector.shape_cast %269 : vector<16x8xf32> to vector<2x8x8xf32>
    %271 = vector.extract_strided_slice %237 {offsets = [0, 8], sizes = [16, 8], strides = [1, 1]} : vector<16x32xf32> to vector<16x8xf32>
    %272 = vector.shape_cast %271 : vector<16x8xf32> to vector<2x8x8xf32>
    "tpu.trace_start"() <{level = 10 : i32, message = "bqd,bkd->bqk"}> : () -> ()
    %cst_106 = arith.constant dense<0.000000e+00> : vector<2x8x8xf32>
    %273 = tpu.matmul %268, %270, %cst_106 {dimension_numbers = #tpu.dot_dimension_numbers<[2], [2], [1], [1], [0, 0, 0, 1, 1, 1], [0], [0]>} : vector<2x8x8xf32>, vector<2x8x8xf32>, vector<2x8x8xf32> -> vector<2x8x8xf32>
    "tpu.trace_stop"() : () -> ()
    %cst_107 = arith.constant 0.353553385 : f32
    %274 = vector.broadcast %cst_107 : f32 to vector<2x8x8xf32>
    %275 = arith.mulf %273, %274 : vector<2x8x8xf32>
    %276 = vector.broadcast %25 : vector<2x1x8xf32> to vector<2x8x8xf32>
    %277 = arith.addf %275, %276 : vector<2x8x8xf32>
    %cst_108 = arith.constant dense<0xFF800000> : vector<2x8xf32>
    %278 = vector.multi_reduction <maximumf>, %277, %cst_108 [2] : vector<2x8x8xf32> to vector<2x8xf32>
    %279 = vector.shape_cast %278 : vector<2x8xf32> to vector<2x8x1xf32>
    %280 = vector.broadcast %279 : vector<2x8x1xf32> to vector<2x8x8xf32>
    %281 = arith.subf %277, %280 : vector<2x8x8xf32>
    %282 = math.exp %281 : vector<2x8x8xf32>
    %cst_109 = arith.constant dense<0.000000e+00> : vector<2x8xf32>
    %283 = vector.multi_reduction <add>, %282, %cst_109 [2] : vector<2x8x8xf32> to vector<2x8xf32>
    %284 = vector.shape_cast %283 : vector<2x8xf32> to vector<2x8x1xf32>
    %285 = tpu.reciprocal %284 {approx = true} : vector<2x8x1xf32> -> vector<2x8x1xf32>
    %286 = vector.broadcast %285 : vector<2x8x1xf32> to vector<2x8x8xf32>
    %287 = arith.mulf %282, %286 : vector<2x8x8xf32>
    "tpu.trace_start"() <{level = 10 : i32, message = "bqk,bkd->bqd"}> : () -> ()
    %cst_110 = arith.constant dense<0.000000e+00> : vector<2x8x8xf32>
    %288 = tpu.matmul %287, %272, %cst_110 {dimension_numbers = #tpu.dot_dimension_numbers<[2], [1], [1], [2], [0, 0, 0, 1, 1, 2], [0], [0]>} : vector<2x8x8xf32>, vector<2x8x8xf32>, vector<2x8x8xf32> -> vector<2x8x8xf32>
    "tpu.trace_stop"() : () -> ()
    %289 = vector.shape_cast %288 : vector<2x8x8xf32> to vector<16x8xf32>
    %290 = vector.extract_strided_slice %239 {offsets = [8, 0], sizes = [8, 32], strides = [1, 1]} : vector<32x32xf32> to vector<8x32xf32>
    %cst_111 = arith.constant dense<0.000000e+00> : vector<16x32xf32>
    %291 = tpu.matmul %289, %290, %cst_111 {dimension_numbers = #tpu.dot_dimension_numbers<[1], [0], [0], [1], [0, 0, 1, 1], [], []>} : vector<16x8xf32>, vector<8x32xf32>, vector<16x32xf32> -> vector<16x32xf32>
    %292 = arith.addf %266, %291 : vector<16x32xf32>
    %293 = vector.extract_strided_slice %235 {offsets = [0, 16], sizes = [16, 8], strides = [1, 1]} : vector<16x32xf32> to vector<16x8xf32>
    %294 = vector.shape_cast %293 : vector<16x8xf32> to vector<2x8x8xf32>
    %295 = vector.extract_strided_slice %236 {offsets = [0, 16], sizes = [16, 8], strides = [1, 1]} : vector<16x32xf32> to vector<16x8xf32>
    %296 = vector.shape_cast %295 : vector<16x8xf32> to vector<2x8x8xf32>
    %297 = vector.extract_strided_slice %237 {offsets = [0, 16], sizes = [16, 8], strides = [1, 1]} : vector<16x32xf32> to vector<16x8xf32>
    %298 = vector.shape_cast %297 : vector<16x8xf32> to vector<2x8x8xf32>
    "tpu.trace_start"() <{level = 10 : i32, message = "bqd,bkd->bqk"}> : () -> ()
    %cst_112 = arith.constant dense<0.000000e+00> : vector<2x8x8xf32>
    %299 = tpu.matmul %294, %296, %cst_112 {dimension_numbers = #tpu.dot_dimension_numbers<[2], [2], [1], [1], [0, 0, 0, 1, 1, 1], [0], [0]>} : vector<2x8x8xf32>, vector<2x8x8xf32>, vector<2x8x8xf32> -> vector<2x8x8xf32>
    "tpu.trace_stop"() : () -> ()
    %cst_113 = arith.constant 0.353553385 : f32
    %300 = vector.broadcast %cst_113 : f32 to vector<2x8x8xf32>
    %301 = arith.mulf %299, %300 : vector<2x8x8xf32>
    %302 = vector.broadcast %25 : vector<2x1x8xf32> to vector<2x8x8xf32>
    %303 = arith.addf %301, %302 : vector<2x8x8xf32>
    %cst_114 = arith.constant dense<0xFF800000> : vector<2x8xf32>
    %304 = vector.multi_reduction <maximumf>, %303, %cst_114 [2] : vector<2x8x8xf32> to vector<2x8xf32>
    %305 = vector.shape_cast %304 : vector<2x8xf32> to vector<2x8x1xf32>
    %306 = vector.broadcast %305 : vector<2x8x1xf32> to vector<2x8x8xf32>
    %307 = arith.subf %303, %306 : vector<2x8x8xf32>
    %308 = math.exp %307 : vector<2x8x8xf32>
    %cst_115 = arith.constant dense<0.000000e+00> : vector<2x8xf32>
    %309 = vector.multi_reduction <add>, %308, %cst_115 [2] : vector<2x8x8xf32> to vector<2x8xf32>
    %310 = vector.shape_cast %309 : vector<2x8xf32> to vector<2x8x1xf32>
    %311 = tpu.reciprocal %310 {approx = true} : vector<2x8x1xf32> -> vector<2x8x1xf32>
    %312 = vector.broadcast %311 : vector<2x8x1xf32> to vector<2x8x8xf32>
    %313 = arith.mulf %308, %312 : vector<2x8x8xf32>
    "tpu.trace_start"() <{level = 10 : i32, message = "bqk,bkd->bqd"}> : () -> ()
    %cst_116 = arith.constant dense<0.000000e+00> : vector<2x8x8xf32>
    %314 = tpu.matmul %313, %298, %cst_116 {dimension_numbers = #tpu.dot_dimension_numbers<[2], [1], [1], [2], [0, 0, 0, 1, 1, 2], [0], [0]>} : vector<2x8x8xf32>, vector<2x8x8xf32>, vector<2x8x8xf32> -> vector<2x8x8xf32>
    "tpu.trace_stop"() : () -> ()
    %315 = vector.shape_cast %314 : vector<2x8x8xf32> to vector<16x8xf32>
    %316 = vector.extract_strided_slice %239 {offsets = [16, 0], sizes = [8, 32], strides = [1, 1]} : vector<32x32xf32> to vector<8x32xf32>
    %cst_117 = arith.constant dense<0.000000e+00> : vector<16x32xf32>
    %317 = tpu.matmul %315, %316, %cst_117 {dimension_numbers = #tpu.dot_dimension_numbers<[1], [0], [0], [1], [0, 0, 1, 1], [], []>} : vector<16x8xf32>, vector<8x32xf32>, vector<16x32xf32> -> vector<16x32xf32>
    %318 = arith.addf %292, %317 : vector<16x32xf32>
    %319 = vector.extract_strided_slice %235 {offsets = [0, 24], sizes = [16, 8], strides = [1, 1]} : vector<16x32xf32> to vector<16x8xf32>
    %320 = vector.shape_cast %319 : vector<16x8xf32> to vector<2x8x8xf32>
    %321 = vector.extract_strided_slice %236 {offsets = [0, 24], sizes = [16, 8], strides = [1, 1]} : vector<16x32xf32> to vector<16x8xf32>
    %322 = vector.shape_cast %321 : vector<16x8xf32> to vector<2x8x8xf32>
    %323 = vector.extract_strided_slice %237 {offsets = [0, 24], sizes = [16, 8], strides = [1, 1]} : vector<16x32xf32> to vector<16x8xf32>
    %324 = vector.shape_cast %323 : vector<16x8xf32> to vector<2x8x8xf32>
    "tpu.trace_start"() <{level = 10 : i32, message = "bqd,bkd->bqk"}> : () -> ()
    %cst_118 = arith.constant dense<0.000000e+00> : vector<2x8x8xf32>
    %325 = tpu.matmul %320, %322, %cst_118 {dimension_numbers = #tpu.dot_dimension_numbers<[2], [2], [1], [1], [0, 0, 0, 1, 1, 1], [0], [0]>} : vector<2x8x8xf32>, vector<2x8x8xf32>, vector<2x8x8xf32> -> vector<2x8x8xf32>
    "tpu.trace_stop"() : () -> ()
    %cst_119 = arith.constant 0.353553385 : f32
    %326 = vector.broadcast %cst_119 : f32 to vector<2x8x8xf32>
    %327 = arith.mulf %325, %326 : vector<2x8x8xf32>
    %328 = vector.broadcast %25 : vector<2x1x8xf32> to vector<2x8x8xf32>
    %329 = arith.addf %327, %328 : vector<2x8x8xf32>
    %cst_120 = arith.constant dense<0xFF800000> : vector<2x8xf32>
    %330 = vector.multi_reduction <maximumf>, %329, %cst_120 [2] : vector<2x8x8xf32> to vector<2x8xf32>
    %331 = vector.shape_cast %330 : vector<2x8xf32> to vector<2x8x1xf32>
    %332 = vector.broadcast %331 : vector<2x8x1xf32> to vector<2x8x8xf32>
    %333 = arith.subf %329, %332 : vector<2x8x8xf32>
    %334 = math.exp %333 : vector<2x8x8xf32>
    %cst_121 = arith.constant dense<0.000000e+00> : vector<2x8xf32>
    %335 = vector.multi_reduction <add>, %334, %cst_121 [2] : vector<2x8x8xf32> to vector<2x8xf32>
    %336 = vector.shape_cast %335 : vector<2x8xf32> to vector<2x8x1xf32>
    %337 = tpu.reciprocal %336 {approx = true} : vector<2x8x1xf32> -> vector<2x8x1xf32>
    %338 = vector.broadcast %337 : vector<2x8x1xf32> to vector<2x8x8xf32>
    %339 = arith.mulf %334, %338 : vector<2x8x8xf32>
    "tpu.trace_start"() <{level = 10 : i32, message = "bqk,bkd->bqd"}> : () -> ()
    %cst_122 = arith.constant dense<0.000000e+00> : vector<2x8x8xf32>
    %340 = tpu.matmul %339, %324, %cst_122 {dimension_numbers = #tpu.dot_dimension_numbers<[2], [1], [1], [2], [0, 0, 0, 1, 1, 2], [0], [0]>} : vector<2x8x8xf32>, vector<2x8x8xf32>, vector<2x8x8xf32> -> vector<2x8x8xf32>
    "tpu.trace_stop"() : () -> ()
    %341 = vector.shape_cast %340 : vector<2x8x8xf32> to vector<16x8xf32>
    %342 = vector.extract_strided_slice %239 {offsets = [24, 0], sizes = [8, 32], strides = [1, 1]} : vector<32x32xf32> to vector<8x32xf32>
    %cst_123 = arith.constant dense<0.000000e+00> : vector<16x32xf32>
    %343 = tpu.matmul %341, %342, %cst_123 {dimension_numbers = #tpu.dot_dimension_numbers<[1], [0], [0], [1], [0, 0, 1, 1], [], []>} : vector<16x8xf32>, vector<8x32xf32>, vector<16x32xf32> -> vector<16x32xf32>
    %344 = arith.addf %318, %343 : vector<16x32xf32>
    %c1_124 = arith.constant 1 : index
    %c0_125 = arith.constant 0 : index
    %c0_126 = arith.constant 0 : index
    %345 = vector.load %arg7[%c1_124, %c0_125, %c0_126] : memref<2x1x32xf32, #tpu.memory_space<vmem>>, vector<1x1x32xf32>
    %346 = vector.shape_cast %345 : vector<1x1x32xf32> to vector<1x32xf32>
    %347 = vector.broadcast %346 : vector<1x32xf32> to vector<16x32xf32>
    %348 = arith.addf %344, %347 : vector<16x32xf32>
    %349 = arith.addf %227, %348 : vector<16x32xf32>
    %c1_127 = arith.constant 1 : index
    %c0_128 = arith.constant 0 : index
    %c0_129 = arith.constant 0 : index
    %350 = vector.load %arg8[%c1_127, %c0_128, %c0_129] : memref<2x1x32xf32, #tpu.memory_space<vmem>>, vector<1x1x32xf32>
    %351 = vector.shape_cast %350 : vector<1x1x32xf32> to vector<1x32xf32>
    %c1_130 = arith.constant 1 : index
    %c0_131 = arith.constant 0 : index
    %c0_132 = arith.constant 0 : index
    %352 = vector.load %arg9[%c1_130, %c0_131, %c0_132] : memref<2x1x32xf32, #tpu.memory_space<vmem>>, vector<1x1x32xf32>
    %353 = vector.shape_cast %352 : vector<1x1x32xf32> to vector<1x32xf32>
    %cst_133 = arith.constant dense<0.000000e+00> : vector<16xf32>
    %354 = vector.multi_reduction <add>, %349, %cst_133 [1] : vector<16x32xf32> to vector<16xf32>
    %355 = vector.shape_cast %354 : vector<16xf32> to vector<16x1xf32>
    %cst_134 = arith.constant 3.200000e+01 : f32
    %356 = vector.broadcast %cst_134 : f32 to vector<16x1xf32>
    %357 = arith.divf %355, %356 : vector<16x1xf32>
    %358 = vector.broadcast %357 : vector<16x1xf32> to vector<16x32xf32>
    %359 = arith.subf %349, %358 : vector<16x32xf32>
    %360 = arith.mulf %359, %359 : vector<16x32xf32>
    %cst_135 = arith.constant dense<0.000000e+00> : vector<16xf32>
    %361 = vector.multi_reduction <add>, %360, %cst_135 [1] : vector<16x32xf32> to vector<16xf32>
    %362 = vector.shape_cast %361 : vector<16xf32> to vector<16x1xf32>
    %cst_136 = arith.constant 3.200000e+01 : f32
    %363 = vector.broadcast %cst_136 : f32 to vector<16x1xf32>
    %364 = arith.divf %362, %363 : vector<16x1xf32>
    %365 = vector.broadcast %357 : vector<16x1xf32> to vector<16x32xf32>
    %366 = arith.subf %349, %365 : vector<16x32xf32>
    %cst_137 = arith.constant 9.99999974E-6 : f32
    %367 = vector.broadcast %cst_137 : f32 to vector<16x1xf32>
    %368 = arith.addf %364, %367 : vector<16x1xf32>
    %369 = math.rsqrt %368 : vector<16x1xf32>
    %370 = vector.broadcast %369 : vector<16x1xf32> to vector<16x32xf32>
    %371 = arith.mulf %366, %370 : vector<16x32xf32>
    %372 = vector.broadcast %351 : vector<1x32xf32> to vector<16x32xf32>
    %373 = arith.mulf %371, %372 : vector<16x32xf32>
    %374 = vector.broadcast %353 : vector<1x32xf32> to vector<16x32xf32>
    %375 = arith.addf %373, %374 : vector<16x32xf32>
    %c1_138 = arith.constant 1 : index
    %c0_139 = arith.constant 0 : index
    %c0_140 = arith.constant 0 : index
    %376 = vector.load %arg10[%c1_138, %c0_139, %c0_140] : memref<2x32x64xf32, #tpu.memory_space<vmem>>, vector<1x32x64xf32>
    %377 = vector.shape_cast %376 : vector<1x32x64xf32> to vector<32x64xf32>
    %cst_141 = arith.constant dense<0.000000e+00> : vector<16x64xf32>
    %378 = tpu.matmul %375, %377, %cst_141 {dimension_numbers = #tpu.dot_dimension_numbers<[1], [0], [0], [1], [0, 0, 1, 1], [], []>} : vector<16x32xf32>, vector<32x64xf32>, vector<16x64xf32> -> vector<16x64xf32>
    %c1_142 = arith.constant 1 : index
    %c0_143 = arith.constant 0 : index
    %c0_144 = arith.constant 0 : index
    %379 = vector.load %arg11[%c1_142, %c0_143, %c0_144] : memref<2x1x64xf32, #tpu.memory_space<vmem>>, vector<1x1x64xf32>
    %380 = vector.shape_cast %379 : vector<1x1x64xf32> to vector<1x64xf32>
    %381 = vector.broadcast %380 : vector<1x64xf32> to vector<16x64xf32>
    %382 = arith.addf %378, %381 : vector<16x64xf32>
    %383 = arith.mulf %382, %382 : vector<16x64xf32>
    %384 = arith.mulf %382, %383 : vector<16x64xf32>
    %cst_145 = arith.constant 4.471500e-02 : f32
    %385 = vector.broadcast %cst_145 : f32 to vector<16x64xf32>
    %386 = arith.mulf %385, %384 : vector<16x64xf32>
    %387 = arith.addf %382, %386 : vector<16x64xf32>
    %cst_146 = arith.constant 0.797884583 : f32
    %388 = vector.broadcast %cst_146 : f32 to vector<16x64xf32>
    %389 = arith.mulf %388, %387 : vector<16x64xf32>
    %390 = math.tanh %389 : vector<16x64xf32>
    %cst_147 = arith.constant 1.000000e+00 : f32
    %391 = vector.broadcast %cst_147 : f32 to vector<16x64xf32>
    %392 = arith.addf %391, %390 : vector<16x64xf32>
    %cst_148 = arith.constant 5.000000e-01 : f32
    %393 = vector.broadcast %cst_148 : f32 to vector<16x64xf32>
    %394 = arith.mulf %393, %392 : vector<16x64xf32>
    %395 = arith.mulf %382, %394 : vector<16x64xf32>
    %c1_149 = arith.constant 1 : index
    %c0_150 = arith.constant 0 : index
    %c0_151 = arith.constant 0 : index
    %396 = vector.load %arg12[%c1_149, %c0_150, %c0_151] : memref<2x64x32xf32, #tpu.memory_space<vmem>>, vector<1x64x32xf32>
    %397 = vector.shape_cast %396 : vector<1x64x32xf32> to vector<64x32xf32>
    %cst_152 = arith.constant dense<0.000000e+00> : vector<16x32xf32>
    %398 = tpu.matmul %395, %397, %cst_152 {dimension_numbers = #tpu.dot_dimension_numbers<[1], [0], [0], [1], [0, 0, 1, 1], [], []>} : vector<16x64xf32>, vector<64x32xf32>, vector<16x32xf32> -> vector<16x32xf32>
    %c1_153 = arith.constant 1 : index
    %c0_154 = arith.constant 0 : index
    %c0_155 = arith.constant 0 : index
    %399 = vector.load %arg13[%c1_153, %c0_154, %c0_155] : memref<2x1x32xf32, #tpu.memory_space<vmem>>, vector<1x1x32xf32>
    %400 = vector.shape_cast %399 : vector<1x1x32xf32> to vector<1x32xf32>
    %401 = vector.broadcast %400 : vector<1x32xf32> to vector<16x32xf32>
    %402 = arith.addf %398, %401 : vector<16x32xf32>
    %403 = arith.addf %375, %402 : vector<16x32xf32>
    %c1_156 = arith.constant 1 : index
    %c0_157 = arith.constant 0 : index
    %c0_158 = arith.constant 0 : index
    %404 = vector.load %arg14[%c1_156, %c0_157, %c0_158] : memref<2x1x32xf32, #tpu.memory_space<vmem>>, vector<1x1x32xf32>
    %405 = vector.shape_cast %404 : vector<1x1x32xf32> to vector<1x32xf32>
    %c1_159 = arith.constant 1 : index
    %c0_160 = arith.constant 0 : index
    %c0_161 = arith.constant 0 : index
    %406 = vector.load %arg15[%c1_159, %c0_160, %c0_161] : memref<2x1x32xf32, #tpu.memory_space<vmem>>, vector<1x1x32xf32>
    %407 = vector.shape_cast %406 : vector<1x1x32xf32> to vector<1x32xf32>
    %cst_162 = arith.constant dense<0.000000e+00> : vector<16xf32>
    %408 = vector.multi_reduction <add>, %403, %cst_162 [1] : vector<16x32xf32> to vector<16xf32>
    %409 = vector.shape_cast %408 : vector<16xf32> to vector<16x1xf32>
    %cst_163 = arith.constant 3.200000e+01 : f32
    %410 = vector.broadcast %cst_163 : f32 to vector<16x1xf32>
    %411 = arith.divf %409, %410 : vector<16x1xf32>
    %412 = vector.broadcast %411 : vector<16x1xf32> to vector<16x32xf32>
    %413 = arith.subf %403, %412 : vector<16x32xf32>
    %414 = arith.mulf %413, %413 : vector<16x32xf32>
    %cst_164 = arith.constant dense<0.000000e+00> : vector<16xf32>
    %415 = vector.multi_reduction <add>, %414, %cst_164 [1] : vector<16x32xf32> to vector<16xf32>
    %416 = vector.shape_cast %415 : vector<16xf32> to vector<16x1xf32>
    %cst_165 = arith.constant 3.200000e+01 : f32
    %417 = vector.broadcast %cst_165 : f32 to vector<16x1xf32>
    %418 = arith.divf %416, %417 : vector<16x1xf32>
    %419 = vector.broadcast %411 : vector<16x1xf32> to vector<16x32xf32>
    %420 = arith.subf %403, %419 : vector<16x32xf32>
    %cst_166 = arith.constant 9.99999974E-6 : f32
    %421 = vector.broadcast %cst_166 : f32 to vector<16x1xf32>
    %422 = arith.addf %418, %421 : vector<16x1xf32>
    %423 = math.rsqrt %422 : vector<16x1xf32>
    %424 = vector.broadcast %423 : vector<16x1xf32> to vector<16x32xf32>
    %425 = arith.mulf %420, %424 : vector<16x32xf32>
    %426 = vector.broadcast %405 : vector<1x32xf32> to vector<16x32xf32>
    %427 = arith.mulf %425, %426 : vector<16x32xf32>
    %428 = vector.broadcast %407 : vector<1x32xf32> to vector<16x32xf32>
    %429 = arith.addf %427, %428 : vector<16x32xf32>
    %430 = vector.shape_cast %429 : vector<16x32xf32> to vector<2x8x32xf32>
    %cst_167 = arith.constant dense<0.000000e+00> : vector<2x32xf32>
    %431 = vector.multi_reduction <add>, %430, %cst_167 [1] : vector<2x8x32xf32> to vector<2x32xf32>
    %cst_168 = arith.constant 8.000000e+00 : f32
    %432 = vector.broadcast %cst_168 : f32 to vector<2x32xf32>
    %433 = arith.divf %431, %432 : vector<2x32xf32>
    %c0_169 = arith.constant 0 : index
    %c0_170 = arith.constant 0 : index
    %434 = vector.load %arg16[%c0_169, %c0_170] : memref<32x6xf32, #tpu.memory_space<vmem>>, vector<32x6xf32>
    %cst_171 = arith.constant dense<0.000000e+00> : vector<2x6xf32>
    %435 = tpu.matmul %433, %434, %cst_171 {dimension_numbers = #tpu.dot_dimension_numbers<[1], [0], [0], [1], [0, 0, 1, 1], [], []>} : vector<2x32xf32>, vector<32x6xf32>, vector<2x6xf32> -> vector<2x6xf32>
    %c0_172 = arith.constant 0 : index
    %c0_173 = arith.constant 0 : index
    %436 = vector.load %arg17[%c0_172, %c0_173] : memref<1x6xf32, #tpu.memory_space<vmem>>, vector<1x6xf32>
    %437 = vector.broadcast %436 : vector<1x6xf32> to vector<2x6xf32>
    %438 = arith.addf %435, %437 : vector<2x6xf32>
    %c0_174 = arith.constant 0 : index
    %c0_175 = arith.constant 0 : index
    %439 = vector.load %arg18[%c0_174, %c0_175] : memref<2x6xf32, #tpu.memory_space<vmem>>, vector<2x6xf32>
    tpu.vector_store %arg18[%c0_174, %c0_175], %438 {strides = array<i32>} : memref<2x6xf32, #tpu.memory_space<vmem>>, vector<2x6xf32>,
    return
  }
}

</mosaic_0001>

<bundles_post_ra>
// kernel: webattack_classifier_forward.1
= control target key start
LH: loop header
LB: loop body
LE: loop exit
PB: predicated region body
PF: predicated region fallthrough
CT: control target
= control target key end

     0   :  { %s5867_s0 = inlined_call_operand.vmem [shape: f32[16,32], index: 0, kind: input, shape index: {}]   ;;  %s5868_s1 = inlined_call_operand.vmem [shape: f32[2,1,8], index: 1, kind: input, shape index: {}]   ;;  %s5869_s2 = inlined_call_operand.vmem [shape: f32[1,32], index: 2, kind: input, shape index: {}]   ;;  %s5870_s3 = inlined_call_operand.vmem [shape: f32[1,32], index: 3, kind: input, shape index: {}]   ;;  %s5871_s4 = inlined_call_operand.vmem [shape: f32[2,32,96], index: 4, kind: input, shape index: {}]   ;;  %s5872_s5 = inlined_call_operand.vmem [shape: f32[2,1,96], index: 5, kind: input, shape index: {}]   ;;  %s5873_s6 = inlined_call_operand.vmem [shape: f32[2,32,32], index: 6, kind: input, shape index: {}]   ;;  %s5874_s7 = inlined_call_operand.vmem [shape: f32[2,1,32], index: 7, kind: input, shape index: {}]   ;;  %s5875_s8 = inlined_call_operand.vmem [shape: f32[2,1,32], index: 8, kind: input, shape index: {}]   ;;  %s5876_s9 = inlined_call_operand.vmem [shape: f32[2,1,32], index: 9, kind: input, shape index: {}]   ;;  %s5877_s10 = inlined_call_operand.vmem [shape: f32[2,32,64], index: 10, kind: input, shape index: {}]   ;;  %s5878_s11 = inlined_call_operand.vmem [shape: f32[2,1,64], index: 11, kind: input, shape index: {}]   ;;  %s5879_s12 = inlined_call_operand.vmem [shape: f32[2,64,32], index: 12, kind: input, shape index: {}]   ;;  %s5880_s13 = inlined_call_operand.vmem [shape: f32[2,1,32], index: 13, kind: input, shape index: {}]   ;;  %s5881_s14 = inlined_call_operand.vmem [shape: f32[2,1,32], index: 14, kind: input, shape index: {}]   ;;  %s5882_s15 = inlined_call_operand.vmem [shape: f32[2,1,32], index: 15, kind: input, shape index: {}]   ;;  %s5883_s16 = inlined_call_operand.vmem [shape: f32[32,6], index: 16, kind: input, shape index: {}]   ;;  %s5884_s17 = inlined_call_operand.vmem [shape: f32[1,6], index: 17, kind: input, shape index: {}]   ;;  %s5885_s18 = inlined_call_operand.hbm [shape: f32[2,6], index: 18, kind: output, shape index: {}]  }
   0x1   :  { %5896 = sst [smem:[#allocation5_spill]] %s5867_s0 }
   0x2   :  { %5897 = sst [smem:[#allocation6_spill]] %s5868_s1 }
   0x3   :  { %5898 = sst [smem:[#allocation7_spill]] %s5869_s2 }
   0x4   :  { %s5899_s29 = sld [smem:[#allocation5_spill]]  ;;  %vm64_vm0 = vcmask 261120  }
   0xa   :  { %v60_v0 = vld [vmem:[%s5899_s29] sm:$0xff]  ;;  %v61_v1 = vld [vmem:[%s5899_s29 + $0x8] sm:$0xff] }
   0xb   :  { %23 = vsyncpa [#allocation3], 0  ;;  %v65_v2 = vsel %vm64_vm0, %v60_v0, 0.0  ;;  %v68_v3 = vsel %vm64_vm0, %v61_v1, 0.0  ;;  %v110_v14 = vld [vmem:[%s5871_s4] sm:$0xff]  ;;  %v111_v15 = vld [vmem:[%s5871_s4 + $0x8] sm:$0xff] }
   0xc   :  { %66 = vadd.xlane.f32.xlu0 %v65_v2  ;;  %v112_v16 = vld [vmem:[%s5871_s4 + $0x10] sm:$0xff]  ;;  %v4942_v17 = vpack.c.bf16 %v111_v15, %v110_v14  ;;  %v113_v18 = vld [vmem:[%s5871_s4 + $0x18] sm:$0xff]  ;;  %s5900_s27 = sld [smem:[#allocation7_spill]]  ;;  %v4387_v29 = vld [vmem:[%s5870_s3] ss:$0 sm:$0xff]  ;;  %v5157_v36 = vmov 0.0  }
   0xd   :  { %v4946_v19 = vpack.c.bf16 %v113_v18, %v112_v16  ;;  %4660 = vmatprep.subr.mxu1 %v5157_v36  ;;  %vm5158_vm1 = vmmov 0   ;;  %v4388_v37 = vld [vmem:[%s5872_s5] ss:$0 sm:$0xff]  ;;  %s5159_s0 = smov 96   ;;  %vm209_vm2 = vcmask 64512   ;;  %s5901_s20 = sld [smem:[#allocation6_spill]] }
   0xe   :  { %4943 = vmatprep.subr.bf16.mxu0 %v4942_v17  ;;  %4662 = vmatprep.mubr.msk.f32.mxu1 %vm5158_vm1, %v5157_v36  ;;  %s5160_s2 = smov 64   ;;  %s5161_s23 = smov 88   ;;  %vm2061_vm3 = vcmask 523264   ;;  %vm4296_vm4 = vcmask 1041409   ;;  %vm4370_vm5 = vcmask 41984  }
   0xf   :  { %4945 = vmatpush3.bf16.msra.mxu0 %v4942_v17  ;;  %s5162_s24 = smov 120   ;;  %s5163_s25 = smov 80  }
  0x10   :  { %69 = vadd.xlane.f32.xlu0 %v68_v3  ;;  %4947 = vmatprep.subr.bf16.mxu0 %v4946_v19  ;;  %s5164_s26 = smov 56   ;;  %s5894_s28 = smov 48  }
  0x11   :  { %s5892_s29 = smov 72   ;;  %s5890_s3 = smov 104  }
  0x12   :  { %v4386_v27 = vld [vmem:[%s5900_s27] ss:$0 sm:$0xff]  ;;  %s5165_s27 = smov 112   ;;  %s5888_s19 = smov 40  }
  0x13   :  { %4949 = vmatpush3.bf16.msra.mxu0 %v4946_v19  ;;  %v5335_v45 = vld [vmem:[%s5901_s20] ss:$0 sm:$0xff]  ;;  %v5341_v50 = vld [vmem:[%s5901_s20 + $0x1] ss:$0 sm:$0xff] }
  0x14   :  { %4680 = vmatprep.subr.mxu0 %v5157_v36 }
  0x99   :  { %v67_v4 = vpop.xlane.xlu0 %66 }
  0x9a   :  { %v72_v5 = vmul.f32 0.03125, %v67_v4 }
  0x9c   :  { %v74_v6 = vsub.f32 %v60_v0, %v72_v5 }
  0x9d   :  { %v70_v7 = vpop.xlane.xlu0 %69 }
  0x9e   :  { %v73_v8 = vmul.f32 0.03125, %v70_v7  ;;  %v76_v9 = vmul.f32 %v74_v6, %v74_v6 }
  0xa0   :  { %v75_v10 = vsub.f32 %v61_v1, %v73_v8  ;;  %v78_v11 = vsel %vm64_vm0, %v76_v9, 0.0 }
  0xa1   :  { %79 = vadd.xlane.f32.xlu1 %v78_v11 }
  0xa2   :  { %v77_v12 = vmul.f32 %v75_v10, %v75_v10 }
  0xa4   :  { %v81_v13 = vsel %vm64_vm0, %v77_v12, 0.0 }
  0xa5   :  { %82 = vadd.xlane.f32.xlu1 %v81_v13 }
 0x12e   :  { %v80_v20 = vpop.xlane.xlu1 %79 }
 0x12f   :  { %v84_v21 = vmul.f32 0.03125, %v80_v20 }
 0x131   :  { %v86_v22 = vadd.f32 1e-05, %v84_v21 }
 0x132   :  { %v83_v23 = vpop.xlane.xlu1 %82 }
 0x133   :  { %5039 = vrsqrt.f32 %v86_v22  ;;  %v85_v24 = vmul.f32 0.03125, %v83_v23 }
 0x135   :  { %v87_v25 = vadd.f32 1e-05, %v85_v24 }
 0x137   :  { %5041 = vrsqrt.f32 %v87_v25 }
 0x13d   :  { %v5040_v26 = vpop.eup %5039 }
 0x13e   :  { %v90_v28 = vmul.f32 %v5040_v26, %v74_v6 }
 0x140   :  { %v98_v30 = vmul.f32 %v4386_v27, %v90_v28 }
 0x141   :  { %v5042_v31 = vpop.eup %5041 }
 0x142   :  { %v91_v32 = vmul.f32 %v5042_v31, %v75_v10  ;;  %v5295_v33 = vadd.f32 %v4387_v29, %v98_v30 }
 0x144   :  { %v99_v34 = vmul.f32 %v4386_v27, %v91_v32  ;;  %4657 = vmatprep.mubr.msk.f32.mxu0 %vm64_vm0, %v5295_v33 }
 0x146   :  { %v5299_v35 = vadd.f32 %v4387_v29, %v99_v34 }
 0x148   :  { %4658 = vmatmul.mubr.msk.f32.vlgmr.msra.gmra.mrb[0].mxu0 %vm64_vm0, %v5299_v35 }
 0x149   :  { %4682 = vmatprep.mubr.msk.f32.mxu0 %vm5158_vm1, %v5157_v36 }
 0x21b   :  { %v4659_v38 = vpop.f32.mrb[0].mxu0 }
 0x21c   :  { %v5312_v39 = vadd.f32 %v4659_v38, %v4388_v37  ;;  %v193_v40 = vpop.f32.mrb[1].mxu0 }
 0x21d   :  { %v5314_v41 = vadd.f32 %v4388_v37, %v193_v40 }
 0x21e   :  { %285 = vrot.lane.b32.xlu1 %v5312_v39, %s5159_s0 }
 0x21f   :  { %207 = vrot.lane.b32.xlu0 %v5314_v41, %s5159_s0 }
 0x290   :  { %v286_v43 = vpop.permute.xlu1 %285 }
 0x291   :  { %v208_v42 = vpop.permute.xlu0 %207 }
 0x292   :  { %4661 = vmatpush3.xpose.msk.msra.mxu1 %vm209_vm2, %v208_v42 }
 0x293   :  { %4665 = vmatprep.subr.mxu1 %v5157_v36 }
 0x295   :  { %4663 = vmatmul.mubr.msk.f32.vlgmr.msra.gmra.mrb[0].mxu1 %vm209_vm2, %v5314_v41 }
 0x296   :  { %4666 = vmatpush3.xpose.msk.msra.mxu1 %vm209_vm2, %v286_v43  ;;  %4667 = vmatprep.mubr.msk.f32.mxu1 %vm5158_vm1, %v5157_v36 }
 0x297   :  { %4670 = vmatprep.subr.mxu1 %v5157_v36 }
 0x299   :  { %4668 = vmatmul.mubr.msk.f32.vlgmr.msra.gmra.mrb[2].mxu1 %vm209_vm2, %v5312_v39 }
 0x29a   :  { %4672 = vmatprep.mubr.msk.f32.mxu1 %vm5158_vm1, %v5157_v36 }
 0x368   :  { %v280_v44 = vpop.f32.mrb[0].mxu1 }
 0x369   :  { %v361_v46 = vmul.f32 0.35355338, %v280_v44  ;;  %v4664_v47 = vpop.f32.mrb[1].mxu1 }
 0x36b   :  { %v375_v48 = vadd.f32 %v5335_v45, %v361_v46 }
 0x36c   :  { %v357_v49 = vpop.f32.mrb[2].mxu1 }
 0x36d   :  { %v362_v51 = vmul.f32 0.35355338, %v357_v49  ;;  %v4669_v52 = vpop.f32.mrb[3].mxu1  ;;  %v377_v53 = vsel %vm209_vm2, %v375_v48, -inf }
 0x36e   :  { %378 = vmax.xlane.f32.xlu1 %v377_v53 }
 0x36f   :  { %v376_v54 = vadd.f32 %v5341_v50, %v362_v51 }
 0x371   :  { %v380_v55 = vsel %vm209_vm2, %v376_v54, -inf }
 0x372   :  { %381 = vmax.xlane.f32.xlu0 %v380_v55 }
 0x37f   :  { %475 = vrot.lane.b32.xlu1 %v5312_v39, %s5160_s2 }
 0x383   :  { %631 = vrot.lane.b32.xlu1 %v5312_v39, %s5161_s23 }
 0x3fb   :  { %v379_v56 = vpop.xlane.xlu1 %378 }
 0x3fc   :  { %v383_v57 = vsub.f32 %v375_v48, %v379_v56 }
 0x3fe   :  { %v385_v58 = vmul.f32 1.442695, %v383_v57 }
 0x3ff   :  { %v382_v59 = vpop.xlane.xlu0 %381  ;;  %v476_v2 = vpop.permute.xlu1 %475 }
 0x400   :  { %5043 = vpow2.f32 %v385_v58  ;;  %v384_v60 = vsub.f32 %v376_v54, %v382_v59 }
 0x402   :  { %v387_v61 = vmul.f32 1.442695, %v384_v60 }
 0x403   :  { %v632_v3 = vpop.permute.xlu1 %631 }
 0x404   :  { %5045 = vpow2.f32 %v387_v61 }
 0x40a   :  { %v5044_v62 = vpop.eup %5043 }
 0x40b   :  { %v389_v63 = vsel %vm209_vm2, %v5044_v62, 0.0 }
 0x40c   :  { %390 = vadd.xlane.f32.xlu0 %v389_v63 }
 0x40e   :  { %v5046_v0 = vpop.eup %5045 }
 0x40f   :  { %v392_v1 = vsel %vm209_vm2, %v5046_v0, 0.0 }
 0x410   :  { %393 = vadd.xlane.f32.xlu1 %v392_v1 }
 0x421   :  { %629 = vrot.lane.b32.xlu1 %v5312_v39, %s5162_s24 }
 0x422   :  { %399 = vrot.lane.b32.xlu0 %v5314_v41, %s5160_s2 }
 0x425   :  { %551 = vrot.lane.b32.xlu1 %v5314_v41, %s5162_s24 }
 0x426   :  { %553 = vrot.lane.b32.xlu0 %v5314_v41, %s5161_s23 }
 0x429   :  { %1049 = vrot.lane.b32.xlu1 %v5314_v41, %s5163_s25 }
 0x499   :  { %v391_v4 = vpop.xlane.xlu0 %390 }
 0x49a   :  { %5047 = vrcp.f32 %v391_v4 }
 0x49d   :  { %v394_v5 = vpop.xlane.xlu1 %393  ;;  %v400_v6 = vpop.permute.xlu0 %399 }
 0x49e   :  { %5049 = vrcp.f32 %v394_v5  ;;  %4671 = vmatpush3.msra.mxu1 %v400_v6  ;;  %v203_v6 = vld [vmem:[%s5873_s6 + $0x8] sm:$0xff] }
 0x49f   :  { %4675 = vmatprep.subr.mxu1 %v5157_v36 }
 0x4a1   :  { %v630_v7 = vpop.permute.xlu1 %629  ;;  %v554_v8 = vpop.permute.xlu0 %553 }
 0x4a2   :  { %4681 = vmatpush3.xpose.msk.msra.mxu0 %vm209_vm2, %v554_v8 }
 0x4a3   :  { %4690 = vmatprep.subr.mxu0 %v5157_v36 }
 0x4a4   :  { %v5048_v9 = vpop.eup %5047 }
 0x4a5   :  { %v397_v10 = vmul.f32 %v5048_v9, %v5044_v62  ;;  %v552_v11 = vpop.permute.xlu1 %551 }
 0x4a6   :  { %4683 = vmatmul.mubr.msk.f32.vlgmr.msra.gmra.mrb[2].mxu0 %vm209_vm2, %v552_v11 }
 0x4a7   :  { %4673 = vmatmul.mubr.msk.f32.vlgmr.msra.gmra.mrb[4].mxu1 %vm209_vm2, %v397_v10  ;;  %4692 = vmatprep.mubr.msk.f32.mxu0 %vm5158_vm1, %v5157_v36 }
 0x4a8   :  { %v5050_v12 = vpop.eup %5049  ;;  %4676 = vmatpush3.msra.mxu1 %v476_v2  ;;  %4677 = vmatprep.mubr.msk.f32.mxu1 %vm5158_vm1, %v5157_v36 }
 0x4a9   :  { %v398_v13 = vmul.f32 %v5050_v12, %v5046_v0  ;;  %4685 = vmatprep.subr.mxu1 %v5157_v36  ;;  %v1050_v37 = vpop.permute.xlu1 %1049 }
 0x4ab   :  { %4678 = vmatmul.mubr.msk.f32.vlgmr.msra.gmra.mrb[6].mxu1 %vm209_vm2, %v398_v13 }
 0x4ac   :  { %4687 = vmatprep.mubr.msk.f32.mxu1 %vm5158_vm1, %v5157_v36 }
 0x4af   :  { %4686 = vmatpush3.xpose.msk.msra.mxu1 %vm209_vm2, %v632_v3 }
 0x4b0   :  { %4695 = vmatprep.subr.mxu1 %v5157_v36 }
 0x4b2   :  { %4688 = vmatmul.mubr.msk.f32.vlgmr.msra.gmra.mrb[8].mxu1 %vm209_vm2, %v630_v7  ;;  %v202_v7 = vld [vmem:[%s5873_s6] sm:$0xff] }
 0x4b3   :  { %4697 = vmatprep.mubr.msk.f32.mxu1 %vm5158_vm1, %v5157_v36 }
 0x579   :  { %v625_v14 = vpop.f32.mrb[2].mxu0 }
 0x57a   :  { %v5380_v15 = vpop.f32.mrb[4].mxu1  ;;  %v4684_v16 = vpop.f32.mrb[3].mxu0  ;;  %v707_v31 = vmul.f32 0.35355338, %v625_v14 }
 0x57b   :  { %v4674_v17 = vpop.f32.mrb[5].mxu1 }
 0x57c   :  { %v709_v32 = vadd.f32 %v5335_v45, %v707_v31 }
 0x57e   :  { %v5382_v18 = vpop.f32.mrb[6].mxu1  ;;  %v711_v34 = vsel %vm209_vm2, %v709_v32, -inf }
 0x57f   :  { %v4679_v19 = vpop.f32.mrb[7].mxu1 }
 0x585   :  { %v703_v20 = vpop.f32.mrb[8].mxu1 }
 0x586   :  { %v708_v21 = vmul.f32 0.35355338, %v703_v20  ;;  %v4689_v22 = vpop.f32.mrb[9].mxu1 }
 0x588   :  { %v710_v23 = vadd.f32 %v5341_v50, %v708_v21 }
 0x58a   :  { %v714_v24 = vsel %vm209_vm2, %v710_v23, -inf }
 0x58b   :  { %715 = vmax.xlane.f32.xlu0 %v714_v24  ;;  %v204_v24 = vld [vmem:[%s5873_s6 + $0x10] sm:$0xff] }
 0x5a1   :  { %809 = vrot.lane.b32.xlu0 %v5312_v39, %s5164_s26 }
 0x5a5   :  { %1047 = vrot.lane.b32.xlu0 %v5314_v41, %s5165_s27 }
 0x5a9   :  { %1125 = vrot.lane.b32.xlu0 %v5312_v39, %s5165_s27 }
 0x618   :  { %v716_v25 = vpop.xlane.xlu0 %715 }
 0x619   :  { %v718_v26 = vsub.f32 %v710_v23, %v716_v25 }
 0x61b   :  { %v721_v27 = vmul.f32 1.442695, %v718_v26 }
 0x61c   :  { %v810_v28 = vpop.permute.xlu0 %809 }
 0x61d   :  { %5051 = vpow2.f32 %v721_v27  ;;  %4696 = vmatpush3.msra.mxu1 %v810_v28 }
 0x61e   :  { %4710 = vmatprep.subr.mxu1 %v5157_v36 }
 0x620   :  { %v1048_v43 = vpop.permute.xlu0 %1047 }
 0x624   :  { %v1126_v46 = vpop.permute.xlu0 %1125 }
 0x627   :  { %v5052_v29 = vpop.eup %5051 }
 0x628   :  { %v726_v30 = vsel %vm209_vm2, %v5052_v29, 0.0 }
 0x629   :  { %727 = vadd.xlane.f32.xlu1 %v726_v30 }
 0x63a   :  { %1127 = vrot.lane.b32.xlu1 %v5312_v39, %s5163_s25 }
 0x65e   :  { %712 = vmax.xlane.f32.xlu1 %v711_v34 }
 0x6b6   :  { %v728_v38 = vpop.xlane.xlu1 %727 }
 0x6b7   :  { %5053 = vrcp.f32 %v728_v38 }
 0x6ba   :  { %v1128_v44 = vpop.permute.xlu1 %1127 }
 0x6c1   :  { %v5054_v40 = vpop.eup %5053 }
 0x6c2   :  { %v732_v42 = vmul.f32 %v5054_v40, %v5052_v29 }
 0x6c4   :  { %4698 = vmatmul.mubr.msk.f32.vlgmr.msra.gmra.mrb[10].mxu1 %vm209_vm2, %v732_v42 }
 0x6c5   :  { %4711 = vmatpush3.xpose.msk.msra.mxu1 %vm209_vm2, %v1050_v37  ;;  %4712 = vmatprep.mubr.msk.f32.mxu1 %vm5158_vm1, %v5157_v36 }
 0x6c6   :  { %4715 = vmatprep.subr.mxu1 %v5157_v36 }
 0x6c8   :  { %4713 = vmatmul.mubr.msk.f32.vlgmr.msra.gmra.mrb[12].mxu1 %vm209_vm2, %v1048_v43 }
 0x6c9   :  { %4716 = vmatpush3.xpose.msk.msra.mxu1 %vm209_vm2, %v1128_v44  ;;  %4717 = vmatprep.mubr.msk.f32.mxu1 %vm5158_vm1, %v5157_v36 }
 0x6ca   :  { %4725 = vmatprep.subr.mxu1 %v5157_v36 }
 0x6cc   :  { %4718 = vmatmul.mubr.msk.f32.vlgmr.msra.gmra.mrb[14].mxu1 %vm209_vm2, %v1126_v46 }
 0x6cd   :  { %4727 = vmatprep.mubr.msk.f32.mxu1 %vm5158_vm1, %v5157_v36 }
 0x6eb   :  { %v713_v47 = vpop.xlane.xlu1 %712 }
 0x6ec   :  { %v717_v48 = vsub.f32 %v709_v32, %v713_v47 }
 0x6ee   :  { %v719_v49 = vmul.f32 1.442695, %v717_v48 }
 0x6f0   :  { %5055 = vpow2.f32 %v719_v49 }
 0x6fa   :  { %v5056_v51 = vpop.eup %5055 }
 0x6fb   :  { %v723_v52 = vsel %vm209_vm2, %v5056_v51, 0.0 }
 0x6fc   :  { %724 = vadd.xlane.f32.xlu0 %v723_v52 }
 0x712   :  { %733 = vrot.lane.b32.xlu0 %v5314_v41, %s5164_s26 }
 0x716   :  { %1305 = vrot.lane.b32.xlu0 %v5312_v39, %s5894_s28 }
 0x71a   :  { %1466 = vrot.lane.b32.xlu0 %v5314_v41, %s5892_s29 }
 0x71e   :  { %1544 = vrot.lane.b32.xlu0 %v5312_v39, %s5892_s29 }
 0x722   :  { %1464 = vrot.lane.b32.xlu0 %v5314_v41, %s5890_s3 }
 0x789   :  { %v725_v53 = vpop.xlane.xlu0 %724 }
 0x78a   :  { %5057 = vrcp.f32 %v725_v53 }
 0x78d   :  { %v734_v54 = vpop.permute.xlu0 %733 }
 0x78e   :  { %4691 = vmatpush3.msra.mxu0 %v734_v54 }
 0x78f   :  { %4700 = vmatprep.subr.mxu0 %v203_v6 }
 0x791   :  { %v1306_v55 = vpop.permute.xlu0 %1305 }
 0x792   :  { %4726 = vmatpush3.msra.mxu1 %v1306_v55 }
 0x793   :  { %4735 = vmatprep.subr.mxu1 %v5157_v36 }
 0x794   :  { %v5058_v56 = vpop.eup %5057 }
 0x795   :  { %v731_v57 = vmul.f32 %v5058_v56, %v5056_v51  ;;  %v1467_v26 = vpop.permute.xlu0 %1466 }
 0x797   :  { %4693 = vmatmul.mubr.msk.f32.vlgmr.msra.gmra.mrb[4].mxu0 %vm209_vm2, %v731_v57  ;;  %v881_v58 = vpop.f32.mrb[10].mxu1 }
 0x798   :  { %v4699_v59 = vpop.f32.mrb[11].mxu1  ;;  %4701 = vmatpush3.msra.mxu0 %v203_v6  ;;  %v205_v6 = vld [vmem:[%s5873_s6 + $0x18] sm:$0xff] }
 0x799   :  { %4705 = vmatprep.subr.mxu0 %v202_v7  ;;  %v1545_v28 = vpop.permute.xlu0 %1544 }
 0x79b   :  { %v1121_v60 = vpop.f32.mrb[12].mxu1 }
 0x79c   :  { %v1203_v61 = vmul.f32 0.35355338, %v1121_v60  ;;  %v4714_v62 = vpop.f32.mrb[13].mxu1 }
 0x79d   :  { %v1465_v30 = vpop.permute.xlu0 %1464 }
 0x79e   :  { %v1205_v63 = vadd.f32 %v5335_v45, %v1203_v61 }
 0x79f   :  { %v1199_v0 = vpop.f32.mrb[14].mxu1 }
 0x7a0   :  { %v1204_v1 = vmul.f32 0.35355338, %v1199_v0  ;;  %v4719_v2 = vpop.f32.mrb[15].mxu1  ;;  %v1207_v3 = vsel %vm209_vm2, %v1205_v63, -inf }
 0x7a1   :  { %1208 = vmax.xlane.f32.xlu1 %v1207_v3 }
 0x7a2   :  { %v1206_v4 = vadd.f32 %v5341_v50, %v1204_v1 }
 0x7a4   :  { %v1210_v5 = vsel %vm209_vm2, %v1206_v4, -inf }
 0x7a5   :  { %1211 = vmax.xlane.f32.xlu1 %v1210_v5 }
 0x82e   :  { %v1209_v8 = vpop.xlane.xlu1 %1208 }
 0x82f   :  { %v1213_v9 = vsub.f32 %v1205_v63, %v1209_v8 }
 0x831   :  { %v1215_v10 = vmul.f32 1.442695, %v1213_v9 }
 0x832   :  { %v1212_v11 = vpop.xlane.xlu1 %1211 }
 0x833   :  { %5059 = vpow2.f32 %v1215_v10  ;;  %v1214_v12 = vsub.f32 %v1206_v4, %v1212_v11  ;;  %v4425_v10 = vld [vmem:[%s5874_s7] ss:$0 sm:$0xff] }
 0x835   :  { %v1217_v13 = vmul.f32 1.442695, %v1214_v12 }
 0x837   :  { %5061 = vpow2.f32 %v1217_v13 }
 0x83d   :  { %v5060_v14 = vpop.eup %5059 }
 0x83e   :  { %v1219_v16 = vsel %vm209_vm2, %v5060_v14, 0.0 }
 0x83f   :  { %1220 = vadd.xlane.f32.xlu1 %v1219_v16 }
 0x841   :  { %v5062_v17 = vpop.eup %5061 }
 0x842   :  { %v1222_v19 = vsel %vm209_vm2, %v5062_v17, 0.0 }
 0x843   :  { %1223 = vadd.xlane.f32.xlu1 %v1222_v19 }
 0x854   :  { %1229 = vrot.lane.b32.xlu1 %v5314_v41, %s5894_s28 }
 0x858   :  { %1542 = vrot.lane.b32.xlu1 %v5312_v39, %s5890_s3  ;;  %s5171_s3 = smov [#allocation2]  }
 0x86a   :  { %v805_v20 = vpop.f32.mrb[4].mxu0 }
 0x86b   :  { %v4694_v21 = vpop.f32.mrb[5].mxu0  ;;  %4702 = vmatprep.mubr.msk.f32.mxu0 %vm209_vm2, %v805_v20 }
 0x86c   :  { %4703 = vmatmul.mubr.msk.f32.vlgmr.msra.gmra.mrb[6].mxu0 %vm209_vm2, %v881_v58 }
 0x86d   :  { %4707 = vmatprep.mubr.msk.f32.mxu0 %vm209_vm2, %v5380_v15  ;;  %4706 = vmatpush3.msra.mxu0 %v202_v7 }
 0x86e   :  { %4720 = vmatprep.subr.mxu0 %v5157_v36 }
 0x874   :  { %4708 = vmatmul.mubr.msk.f32.vlgmr.msra.gmra.mrb[6].mxu0 %vm209_vm2, %v5382_v18 }
 0x875   :  { %4722 = vmatprep.mubr.msk.f32.mxu0 %vm5158_vm1, %v5157_v36 }
 0x8cc   :  { %v1221_v22 = vpop.xlane.xlu1 %1220 }
 0x8cd   :  { %5063 = vrcp.f32 %v1221_v22 }
 0x8d0   :  { %v1224_v23 = vpop.xlane.xlu1 %1223 }
 0x8d1   :  { %5065 = vrcp.f32 %v1224_v23 }
 0x8d4   :  { %v1230_v25 = vpop.permute.xlu1 %1229 }
 0x8d5   :  { %4721 = vmatpush3.msra.mxu0 %v1230_v25 }
 0x8d6   :  { %4730 = vmatprep.subr.mxu0 %v204_v24 }
 0x8d7   :  { %v5064_v15 = vpop.eup %5063 }
 0x8d8   :  { %v1227_v27 = vmul.f32 %v5064_v15, %v5060_v14  ;;  %v1543_v38 = vpop.permute.xlu1 %1542 }
 0x8da   :  { %4723 = vmatmul.mubr.msk.f32.vlgmr.msra.gmra.mrb[8].mxu0 %vm209_vm2, %v1227_v27 }
 0x8db   :  { %v5066_v18 = vpop.eup %5065  ;;  %4731 = vmatpush3.msra.mxu0 %v204_v24 }
 0x8dc   :  { %v1228_v29 = vmul.f32 %v5066_v18, %v5062_v17  ;;  %4740 = vmatprep.subr.mxu0 %v5157_v36 }
 0x8de   :  { %4728 = vmatmul.mubr.msk.f32.vlgmr.msra.gmra.mrb[16].mxu1 %vm209_vm2, %v1228_v29 }
 0x8df   :  { %4736 = vmatpush3.xpose.msk.msra.mxu1 %vm209_vm2, %v1467_v26  ;;  %4737 = vmatprep.mubr.msk.f32.mxu1 %vm5158_vm1, %v5157_v36 }
 0x8e0   :  { %4745 = vmatprep.subr.mxu1 %v5157_v36 }
 0x8e2   :  { %4738 = vmatmul.mubr.msk.f32.vlgmr.msra.gmra.mrb[18].mxu1 %vm209_vm2, %v1465_v30  ;;  %v1938_v30 = vld [vmem:[%s5877_s10 + $0x10] sm:$0xff] }
 0x8e3   :  { %4747 = vmatprep.mubr.msk.f32.mxu1 %vm5158_vm1, %v5157_v36 }
 0x9ad   :  { %v1301_v31 = vpop.f32.mrb[8].mxu0 }
 0x9ae   :  { %v4724_v32 = vpop.f32.mrb[9].mxu0  ;;  %4732 = vmatprep.mubr.msk.f32.mxu0 %vm209_vm2, %v1301_v31  ;;  %v1939_v31 = vld [vmem:[%s5877_s10 + $0x18] sm:$0xff] }
 0x9af   :  { %v4954_v32 = vpack.c.bf16 %v1939_v31, %v1938_v30 }
 0x9b1   :  { %v1377_v34 = vpop.f32.mrb[16].mxu1 }
 0x9b2   :  { %v4729_v37 = vpop.f32.mrb[17].mxu1  ;;  %4733 = vmatmul.mubr.msk.f32.vlgmr.msra.gmra.mrb[6].mxu0 %vm209_vm2, %v1377_v34 }
 0x9b3   :  { %4741 = vmatpush3.xpose.msk.msra.mxu0 %vm209_vm2, %v1545_v28  ;;  %4742 = vmatprep.mubr.msk.f32.mxu0 %vm5158_vm1, %v5157_v36  ;;  %v1937_v28 = vld [vmem:[%s5877_s10 + $0x8] sm:$0xff] }
 0x9b4   :  { %4750 = vmatprep.subr.mxu0 %v5157_v36 }
 0x9b5   :  { %v1538_v40 = vpop.f32.mrb[18].mxu1 }
 0x9b6   :  { %v1620_v42 = vmul.f32 0.35355338, %v1538_v40  ;;  %v4739_v43 = vpop.f32.mrb[19].mxu1  ;;  %4743 = vmatmul.mubr.msk.f32.vlgmr.msra.gmra.mrb[10].mxu0 %vm209_vm2, %v1543_v38 }
 0x9b7   :  { %4752 = vmatprep.mubr.msk.f32.mxu0 %vm5158_vm1, %v5157_v36 }
 0x9b8   :  { %v1622_v44 = vadd.f32 %v5335_v45, %v1620_v42 }
 0x9ba   :  { %v1624_v46 = vsel %vm209_vm2, %v1622_v44, -inf }
 0x9bb   :  { %1625 = vmax.xlane.f32.xlu0 %v1624_v46  ;;  %v4426_v46 = vld [vmem:[%s5875_s8] ss:$0 sm:$0xff] }
 0xa48   :  { %v1626_v47 = vpop.xlane.xlu0 %1625 }
 0xa49   :  { %v1630_v48 = vsub.f32 %v1622_v44, %v1626_v47 }
 0xa4b   :  { %v1632_v49 = vmul.f32 1.442695, %v1630_v48 }
 0xa4d   :  { %5067 = vpow2.f32 %v1632_v49 }
 0xa57   :  { %v5068_v51 = vpop.eup %5067 }
 0xa58   :  { %v1636_v52 = vsel %vm209_vm2, %v5068_v51, 0.0 }
 0xa59   :  { %1637 = vadd.xlane.f32.xlu0 %v1636_v52 }
 0xa89   :  { %v1616_v53 = vpop.f32.mrb[10].mxu0 }
 0xa8a   :  { %v1621_v54 = vmul.f32 0.35355338, %v1616_v53  ;;  %v4744_v55 = vpop.f32.mrb[11].mxu0 }
 0xa8c   :  { %v1623_v56 = vadd.f32 %v5341_v50, %v1621_v54 }
 0xa8e   :  { %v1627_v57 = vsel %vm209_vm2, %v1623_v56, -inf }
 0xa8f   :  { %1628 = vmax.xlane.f32.xlu1 %v1627_v57  ;;  %v2047_v57 = vld [vmem:[%s5879_s12 + $0x8] sm:$0xff] }
 0xaa0   :  { %1722 = vrot.lane.b32.xlu1 %v5312_v39, %s5888_s19 }
 0xae6   :  { %v1638_v0 = vpop.xlane.xlu0 %1637 }
 0xb1c   :  { %v1629_v58 = vpop.xlane.xlu1 %1628 }
 0xb1d   :  { %v1631_v59 = vsub.f32 %v1623_v56, %v1629_v58  ;;  %v2046_v56 = vld [vmem:[%s5879_s12] sm:$0xff] }
 0xb1e   :  { %v4958_v58 = vpack.c.bf16 %v2047_v57, %v2046_v56 }
 0xb1f   :  { %v1634_v60 = vmul.f32 1.442695, %v1631_v59  ;;  %v2048_v59 = vld [vmem:[%s5879_s12 + $0x10] sm:$0xff] }
 0xb20   :  { %v1723_v61 = vpop.permute.xlu1 %1722 }
 0xb21   :  { %5069 = vpow2.f32 %v1634_v60  ;;  %4751 = vmatpush3.msra.mxu0 %v1723_v61  ;;  %v2049_v60 = vld [vmem:[%s5879_s12 + $0x18] sm:$0xff] }
 0xb22   :  { %5071 = vrcp.f32 %v1638_v0  ;;  %4755 = vmatprep.subr.mxu0 %v205_v6  ;;  %v4962_v61 = vpack.c.bf16 %v2049_v60, %v2048_v59 }
 0xb2b   :  { %v5070_v62 = vpop.eup %5069 }
 0xb2c   :  { %v1639_v63 = vsel %vm209_vm2, %v5070_v62, 0.0  ;;  %v5072_v2 = vpop.eup %5071 }
 0xb2d   :  { %1640 = vadd.xlane.f32.xlu0 %v1639_v63  ;;  %v1644_v3 = vmul.f32 %v5072_v2, %v5068_v51  ;;  %v4427_v51 = vld [vmem:[%s5876_s9] ss:$0 sm:$0xff]  ;;  %v2051_v63 = vld [vmem:[%s5879_s12 + $0x28] sm:$0xff]  ;;  %v2053_v2 = vld [vmem:[%s5879_s12 + $0x38] sm:$0xff] }
 0xb43   :  { %1646 = vrot.lane.b32.xlu0 %v5314_v41, %s5888_s19  ;;  %s5905_s19 = smov 40  }
 0xbba   :  { %v1641_v1 = vpop.xlane.xlu0 %1640 }
 0xbbb   :  { %5073 = vrcp.f32 %v1641_v1  ;;  %v2052_v1 = vld [vmem:[%s5879_s12 + $0x30] sm:$0xff] }
 0xbbe   :  { %v1647_v39 = vpop.permute.xlu0 %1646 }
 0xbbf   :  { %4746 = vmatpush3.msra.mxu1 %v1647_v39  ;;  %v4428_v39 = vld [vmem:[%s5878_s11] ss:$0 sm:$0xff] }
 0xbc0   :  { %4748 = vmatmul.mubr.msk.f32.vlgmr.msra.gmra.mrb[20].mxu1 %vm209_vm2, %v1644_v3  ;;  %v4970_v3 = vpack.c.bf16 %v2053_v2, %v2052_v1  ;;  %v4435_v2 = vld [vmem:[%s5882_s15] ss:$0 sm:$0xff] }
 0xbc5   :  { %v5074_v4 = vpop.eup %5073 }
 0xbc6   :  { %v1645_v5 = vmul.f32 %v5074_v4, %v5070_v62  ;;  %v2050_v62 = vld [vmem:[%s5879_s12 + $0x20] sm:$0xff] }
 0xbc7   :  { %v4966_v0 = vpack.c.bf16 %v2051_v63, %v2050_v62  ;;  %v4434_v62 = vld [vmem:[%s5881_s14] ss:$0 sm:$0xff] }
 0xbc8   :  { %4753 = vmatmul.mubr.msk.f32.vlgmr.msra.gmra.mrb[12].mxu0 %vm209_vm2, %v1645_v5 }
 0xbc9   :  { %4756 = vmatpush3.msra.mxu0 %v205_v6 }
 0xbca   :  { %4959 = vmatprep.subr.bf16.mxu0 %v4958_v58 }
 0xc93   :  { %v1718_v41 = vpop.f32.mrb[20].mxu1 }
 0xc94   :  { %v4749_v7 = vpop.f32.mrb[21].mxu1  ;;  %4757 = vmatprep.mubr.msk.f32.mxu0 %vm209_vm2, %v1718_v41 }
 0xc9b   :  { %v1794_v8 = vpop.f32.mrb[12].mxu0 }
 0xc9c   :  { %v4754_v9 = vpop.f32.mrb[13].mxu0  ;;  %4758 = vmatmul.mubr.msk.f32.vlgmr.msra.gmra.mrb[6].mxu0 %vm209_vm2, %v1794_v8 }
 0xc9d   :  { %4961 = vmatpush3.bf16.msra.mxu0 %v4958_v58 }
 0xc9e   :  { %4963 = vmatprep.subr.bf16.mxu0 %v4962_v61 }
 0xca1   :  { %4965 = vmatpush3.bf16.msra.mxu0 %v4962_v61 }
 0xca2   :  { %4967 = vmatprep.subr.bf16.mxu0 %v4966_v0 }
 0xca5   :  { %4969 = vmatpush3.bf16.msra.mxu0 %v4966_v0 }
 0xca6   :  { %4971 = vmatprep.subr.bf16.mxu0 %v4970_v3 }
 0xca9   :  { %4973 = vmatpush3.bf16.msra.mxu0 %v4970_v3 }
 0xcaa   :  { %4811 = vmatprep.subr.mxu0 %v5157_v36 }
 0xd6f   :  { %v4759_v11 = vpop.f32.mrb[6].mxu0 }
 0xd70   :  { %v1889_v12 = vadd.f32 %v4759_v11, %v4425_v10  ;;  %v1870_v13 = vpop.f32.mrb[7].mxu0 }
 0xd71   :  { %v1888_v14 = vadd.f32 %v4425_v10, %v1870_v13 }
 0xd72   :  { %v1891_v16 = vadd.f32 %v1889_v12, %v5299_v35 }
 0xd73   :  { %v1890_v17 = vadd.f32 %v1888_v14, %v5295_v33  ;;  %v1936_v33 = vld [vmem:[%s5877_s10] sm:$0xff] }
 0xd74   :  { %v1897_v19 = vsel %vm64_vm0, %v1891_v16, 0.0  ;;  %v4950_v29 = vpack.c.bf16 %v1937_v28, %v1936_v33 }
 0xd75   :  { %1898 = vadd.xlane.f32.xlu0 %v1897_v19  ;;  %v1894_v20 = vsel %vm64_vm0, %v1890_v17, 0.0 }
 0xd76   :  { %1895 = vadd.xlane.f32.xlu1 %v1894_v20  ;;  %4951 = vmatprep.subr.bf16.mxu1 %v4950_v29 }
 0xd77   :  { %4953 = vmatpush3.bf16.msra.mxu1 %v4950_v29 }
 0xd78   :  { %4955 = vmatprep.subr.bf16.mxu1 %v4954_v32 }
 0xd7b   :  { %4957 = vmatpush3.bf16.msra.mxu1 %v4954_v32 }
 0xe02   :  { %v1899_v21 = vpop.xlane.xlu0 %1898 }
 0xe03   :  { %v1901_v22 = vmul.f32 0.03125, %v1899_v21  ;;  %v1896_v23 = vpop.xlane.xlu1 %1895 }
 0xe04   :  { %v1900_v24 = vmul.f32 0.03125, %v1896_v23 }
 0xe05   :  { %v1903_v25 = vsub.f32 %v1891_v16, %v1901_v22 }
 0xe06   :  { %v1902_v26 = vsub.f32 %v1890_v17, %v1900_v24 }
 0xe07   :  { %v1905_v15 = vmul.f32 %v1903_v25, %v1903_v25 }
 0xe08   :  { %v1904_v27 = vmul.f32 %v1902_v26, %v1902_v26 }
 0xe09   :  { %v1909_v18 = vsel %vm64_vm0, %v1905_v15, 0.0  ;;  %v4431_v15 = vld [vmem:[%s5880_s13] ss:$0 sm:$0xff] }
 0xe0a   :  { %1910 = vadd.xlane.f32.xlu1 %v1909_v18  ;;  %v1906_v35 = vsel %vm64_vm0, %v1904_v27, 0.0 }
 0xe0b   :  { %1907 = vadd.xlane.f32.xlu0 %v1906_v35 }
 0xe97   :  { %v1911_v34 = vpop.xlane.xlu1 %1910 }
 0xe98   :  { %v1913_v37 = vmul.f32 0.03125, %v1911_v34  ;;  %v1908_v38 = vpop.xlane.xlu0 %1907 }
 0xe99   :  { %v1912_v40 = vmul.f32 0.03125, %v1908_v38 }
 0xe9a   :  { %v1915_v42 = vadd.f32 1e-05, %v1913_v37 }
 0xe9b   :  { %v1914_v43 = vadd.f32 1e-05, %v1912_v40 }
 0xe9c   :  { %5075 = vrsqrt.f32 %v1915_v42 }
 0xe9d   :  { %5077 = vrsqrt.f32 %v1914_v43 }
 0xea6   :  { %v5076_v44 = vpop.eup %5075 }
 0xea7   :  { %v5078_v47 = vpop.eup %5077  ;;  %v1919_v48 = vmul.f32 %v5076_v44, %v1903_v25 }
 0xea8   :  { %v1918_v49 = vmul.f32 %v5078_v47, %v1902_v26 }
 0xea9   :  { %v1927_v52 = vmul.f32 %v4426_v46, %v1919_v48  ;;  %v4436_v48 = vld [vmem:[%s5871_s4 + $0x20] sm:$0xff] }
 0xeaa   :  { %v1926_v53 = vmul.f32 %v4426_v46, %v1918_v49  ;;  %v4437_v49 = vld [vmem:[%s5871_s4 + $0x28] sm:$0xff] }
 0xeab   :  { %v1935_v55 = vadd.f32 %v4427_v51, %v1927_v52  ;;  %v4438_v52 = vld [vmem:[%s5871_s4 + $0x30] sm:$0xff] }
 0xeac   :  { %v1934_v54 = vadd.f32 %v4427_v51, %v1926_v53  ;;  %v4974_v51 = vpack.c.bf16 %v4437_v49, %v4436_v48  ;;  %v4439_v53 = vld [vmem:[%s5871_s4 + $0x38] sm:$0xff] }
 0xeae   :  { %4768 = vmatprep.mubr.msk.f32.mxu1 %vm64_vm0, %v1934_v54  ;;  %4975 = vmatprep.subr.bf16.mxu1 %v4974_v51 }
 0xeaf   :  { %4769 = vmatmul.mubr.msk.f32.vlgmr.msra.gmra.mrb[22].mxu1 %vm64_vm0, %v1935_v55 }
 0xeb0   :  { %4977 = vmatpush3.bf16.msra.mxu1 %v4974_v51 }
 0xf82   :  { %v4770_v4 = vpop.f32.mrb[22].mxu1 }
 0xf83   :  { %v2025_v5 = vadd.f32 %v4770_v4, %v4428_v39  ;;  %v2019_v6 = vpop.f32.mrb[23].mxu1 }
 0xf84   :  { %v2020_v41 = vadd.f32 %v4428_v39, %v2019_v6  ;;  %v4441_v6 = vld [vmem:[%s5872_s5 + $0x1] ss:$0 sm:$0xff] }
 0xf85   :  { %v2029_v7 = vmul.f32 %v2025_v5, %v2025_v5 }
 0xf86   :  { %v2028_v8 = vmul.f32 %v2020_v41, %v2020_v41 }
 0xf87   :  { %v2031_v9 = vmul.f32 %v2029_v7, %v2025_v5 }
 0xf88   :  { %v2030_v10 = vmul.f32 %v2028_v8, %v2020_v41 }
 0xf89   :  { %v2033_v11 = vmul.f32 0.044715, %v2031_v9 }
 0xf8a   :  { %v2032_v12 = vmul.f32 0.044715, %v2030_v10 }
 0xf8b   :  { %v2035_v13 = vadd.f32 %v2033_v11, %v2025_v5 }
 0xf8c   :  { %v2034_v14 = vadd.f32 %v2032_v12, %v2020_v41 }
 0xf8d   :  { %v2037_v16 = vmul.f32 0.7978846, %v2035_v13 }
 0xf8e   :  { %v2036_v17 = vmul.f32 0.7978846, %v2034_v14 }
 0xf8f   :  { %5079 = vtanh.f32 %v2037_v16 }
 0xf90   :  { %5081 = vtanh.f32 %v2036_v17 }
 0xf99   :  { %v5080_v19 = vpop.eup %5079 }
 0xf9a   :  { %v5082_v20 = vpop.eup %5081  ;;  %v2041_v21 = vadd.f32 1.0, %v5080_v19 }
 0xf9b   :  { %v2040_v22 = vadd.f32 1.0, %v5082_v20 }
 0xf9c   :  { %v2043_v23 = vmul.f32 0.5, %v2041_v21 }
 0xf9d   :  { %v2042_v24 = vmul.f32 0.5, %v2040_v22 }
 0xf9e   :  { %v2045_v26 = vmul.f32 %v2043_v23, %v2025_v5 }
 0xf9f   :  { %v2044_v25 = vmul.f32 %v2042_v24, %v2020_v41 }
 0xfa1   :  { %4787 = vmatprep.mubr.msk.f32.mxu0 %vm2061_vm3, %v2044_v25 }
 0xfa2   :  { %4788 = vmatmul.mubr.msk.f32.vlgmr.msra.gmra.mrb[14].mxu0 %vm2061_vm3, %v2045_v26 }
 0xfa3   :  { %4813 = vmatprep.mubr.msk.f32.mxu0 %vm5158_vm1, %v5157_v36 }
0x1075   :  { %v4789_v27 = vpop.f32.mrb[14].mxu0 }
0x1076   :  { %v2140_v18 = vadd.f32 %v4789_v27, %v4431_v15  ;;  %v2134_v35 = vpop.f32.mrb[15].mxu0 }
0x1077   :  { %v2135_v33 = vadd.f32 %v4431_v15, %v2134_v35 }
0x1078   :  { %v2144_v28 = vadd.f32 %v2140_v18, %v1935_v55 }
0x1079   :  { %v2143_v29 = vadd.f32 %v2135_v33, %v1934_v54  ;;  %v4978_v54 = vpack.c.bf16 %v4439_v53, %v4438_v52  ;;  %v5651_v52 = vld [vmem:[%s5901_s20 + $0x1] ss:$0 sm:$0xff] }
0x107a   :  { %v2150_v30 = vsel %vm64_vm0, %v2144_v28, 0.0 }
0x107b   :  { %2151 = vadd.xlane.f32.xlu1 %v2150_v30  ;;  %v2147_v31 = vsel %vm64_vm0, %v2143_v29, 0.0  ;;  %4979 = vmatprep.subr.bf16.mxu1 %v4978_v54 }
0x107c   :  { %2148 = vadd.xlane.f32.xlu0 %v2147_v31  ;;  %4981 = vmatpush3.bf16.msra.mxu1 %v4978_v54 }
0x107d   :  { %4801 = vmatprep.subr.mxu1 %v5157_v36 }
0x1108   :  { %v2152_v32 = vpop.xlane.xlu1 %2151 }
0x1109   :  { %v2154_v34 = vmul.f32 0.03125, %v2152_v32  ;;  %v2149_v37 = vpop.xlane.xlu0 %2148 }
0x110a   :  { %v2153_v38 = vmul.f32 0.03125, %v2149_v37 }
0x110b   :  { %v2156_v40 = vsub.f32 %v2144_v28, %v2154_v34 }
0x110c   :  { %v2155_v42 = vsub.f32 %v2143_v29, %v2153_v38 }
0x110d   :  { %v2158_v43 = vmul.f32 %v2156_v40, %v2156_v40 }
0x110e   :  { %v2157_v44 = vmul.f32 %v2155_v42, %v2155_v42 }
0x110f   :  { %v2162_v46 = vsel %vm64_vm0, %v2158_v43, 0.0 }
0x1110   :  { %2163 = vadd.xlane.f32.xlu1 %v2162_v46  ;;  %v2159_v47 = vsel %vm64_vm0, %v2157_v44, 0.0 }
0x1111   :  { %2160 = vadd.xlane.f32.xlu0 %v2159_v47 }
0x119d   :  { %v2164_v55 = vpop.xlane.xlu1 %2163 }
0x119e   :  { %v2166_v56 = vmul.f32 0.03125, %v2164_v55  ;;  %v2161_v57 = vpop.xlane.xlu0 %2160 }
0x119f   :  { %v2165_v58 = vmul.f32 0.03125, %v2161_v57 }
0x11a0   :  { %v2168_v59 = vadd.f32 1e-05, %v2166_v56 }
0x11a1   :  { %v2167_v60 = vadd.f32 1e-05, %v2165_v58 }
0x11a2   :  { %5083 = vrsqrt.f32 %v2168_v59 }
0x11a3   :  { %5085 = vrsqrt.f32 %v2167_v60 }
0x11ac   :  { %v5084_v61 = vpop.eup %5083 }
0x11ad   :  { %v5086_v63 = vpop.eup %5085  ;;  %v2172_v0 = vmul.f32 %v5084_v61, %v2156_v40 }
0x11ae   :  { %v2171_v1 = vmul.f32 %v5086_v63, %v2155_v42 }
0x11af   :  { %v2180_v3 = vmul.f32 %v4434_v62, %v2172_v0 }
0x11b0   :  { %v2179_v39 = vmul.f32 %v4434_v62, %v2171_v1 }
0x11b1   :  { %v5577_v5 = vadd.f32 %v4435_v2, %v2180_v3 }
0x11b2   :  { %v5575_v4 = vadd.f32 %v4435_v2, %v2179_v39  ;;  %v5670_v2 = vld [vmem:[%s5901_s20] ss:$0 sm:$0xff]  ;;  %s5902_s20 = smov 48  }
0x11b4   :  { %4798 = vmatprep.mubr.msk.f32.mxu1 %vm64_vm0, %v5575_v4 }
0x11b5   :  { %4799 = vmatmul.mubr.msk.f32.vlgmr.msra.gmra.mrb[24].mxu1 %vm64_vm0, %v5577_v5 }
0x11b6   :  { %4803 = vmatprep.mubr.msk.f32.mxu1 %vm5158_vm1, %v5157_v36 }
0x1288   :  { %v4800_v41 = vpop.f32.mrb[24].mxu1 }
0x1289   :  { %v5588_v7 = vadd.f32 %v4800_v41, %v4441_v6  ;;  %v2274_v8 = vpop.f32.mrb[25].mxu1 }
0x128a   :  { %v5590_v9 = vadd.f32 %v4441_v6, %v2274_v8 }
0x128b   :  { %2366 = vrot.lane.b32.xlu1 %v5588_v7, %s5159_s0 }
0x128c   :  { %2289 = vrot.lane.b32.xlu0 %v5590_v9, %s5159_s0 }
0x12fd   :  { %v2367_v11 = vpop.permute.xlu1 %2366 }
0x12fe   :  { %v2290_v10 = vpop.permute.xlu0 %2289 }
0x12ff   :  { %4802 = vmatpush3.xpose.msk.msra.mxu1 %vm209_vm2, %v2290_v10 }
0x1300   :  { %4806 = vmatprep.subr.mxu1 %v5157_v36 }
0x1302   :  { %4804 = vmatmul.mubr.msk.f32.vlgmr.msra.gmra.mrb[26].mxu1 %vm209_vm2, %v5590_v9 }
0x1303   :  { %4807 = vmatpush3.xpose.msk.msra.mxu1 %vm209_vm2, %v2367_v11  ;;  %4808 = vmatprep.mubr.msk.f32.mxu1 %vm5158_vm1, %v5157_v36 }
0x1304   :  { %4816 = vmatprep.subr.mxu1 %v5157_v36 }
0x1306   :  { %4809 = vmatmul.mubr.msk.f32.vlgmr.msra.gmra.mrb[28].mxu1 %vm209_vm2, %v5588_v7 }
0x1307   :  { %4818 = vmatprep.mubr.msk.f32.mxu1 %vm5158_vm1, %v5157_v36 }
0x13d5   :  { %v2361_v12 = vpop.f32.mrb[26].mxu1 }
0x13d6   :  { %v4805_v13 = vpop.f32.mrb[27].mxu1  ;;  %v2442_v21 = vmul.f32 0.35355338, %v2361_v12 }
0x13d8   :  { %v2444_v22 = vadd.f32 %v5335_v45, %v2442_v21 }
0x13d9   :  { %v2438_v14 = vpop.f32.mrb[28].mxu1 }
0x13da   :  { %v2443_v16 = vmul.f32 0.35355338, %v2438_v14  ;;  %v4810_v17 = vpop.f32.mrb[29].mxu1  ;;  %v2446_v23 = vsel %vm209_vm2, %v2444_v22, -inf }
0x13dc   :  { %v2445_v19 = vadd.f32 %v5341_v50, %v2443_v16 }
0x13de   :  { %v2449_v20 = vsel %vm209_vm2, %v2445_v19, -inf }
0x13df   :  { %2450 = vmax.xlane.f32.xlu1 %v2449_v20 }
0x13f0   :  { %2700 = vrot.lane.b32.xlu1 %v5588_v7, %s5161_s23 }
0x13f4   :  { %2698 = vrot.lane.b32.xlu1 %v5588_v7, %s5162_s24 }
0x1418   :  { %2447 = vmax.xlane.f32.xlu1 %v2446_v23 }
0x1429   :  { %2622 = vrot.lane.b32.xlu1 %v5590_v9, %s5161_s23 }
0x142d   :  { %2620 = vrot.lane.b32.xlu1 %v5590_v9, %s5162_s24  ;;  %s5903_s24 = smov 72  }
0x1431   :  { %3118 = vrot.lane.b32.xlu1 %v5590_v9, %s5163_s25 }
0x146c   :  { %v2451_v50 = vpop.xlane.xlu1 %2450 }
0x146d   :  { %v2453_v24 = vsub.f32 %v2445_v19, %v2451_v50 }
0x146f   :  { %v2456_v25 = vmul.f32 1.442695, %v2453_v24 }
0x1470   :  { %v2701_v45 = vpop.permute.xlu1 %2700 }
0x1471   :  { %5087 = vpow2.f32 %v2456_v25 }
0x1474   :  { %v2699_v27 = vpop.permute.xlu1 %2698 }
0x147b   :  { %v5088_v26 = vpop.eup %5087 }
0x147c   :  { %v2461_v15 = vsel %vm209_vm2, %v5088_v26, 0.0 }
0x147d   :  { %2462 = vadd.xlane.f32.xlu0 %v2461_v15 }
0x1493   :  { %2544 = vrot.lane.b32.xlu0 %v5588_v7, %s5160_s2 }
0x14a5   :  { %v2448_v18 = vpop.xlane.xlu1 %2447 }
0x14a6   :  { %v2452_v35 = vsub.f32 %v2444_v22, %v2448_v18 }
0x14a8   :  { %v2454_v33 = vmul.f32 1.442695, %v2452_v35 }
0x14a9   :  { %v2623_v42 = vpop.permute.xlu1 %2622 }
0x14aa   :  { %5089 = vpow2.f32 %v2454_v33 }
0x14ad   :  { %v2621_v44 = vpop.permute.xlu1 %2620 }
0x14b1   :  { %v3119_v6 = vpop.permute.xlu1 %3118 }
0x14b4   :  { %v5090_v28 = vpop.eup %5089 }
0x14b5   :  { %v2458_v29 = vsel %vm209_vm2, %v5090_v28, 0.0 }
0x14b6   :  { %2459 = vadd.xlane.f32.xlu0 %v2458_v29 }
0x14cc   :  { %2468 = vrot.lane.b32.xlu0 %v5590_v9, %s5160_s2 }
0x150a   :  { %v2463_v30 = vpop.xlane.xlu0 %2462 }
0x150b   :  { %5091 = vrcp.f32 %v2463_v30 }
0x150e   :  { %v2545_v31 = vpop.permute.xlu0 %2544 }
0x150f   :  { %4817 = vmatpush3.msra.mxu1 %v2545_v31 }
0x1510   :  { %4826 = vmatprep.subr.mxu1 %v5157_v36 }
0x1515   :  { %v5092_v32 = vpop.eup %5091 }
0x1516   :  { %v2467_v34 = vmul.f32 %v5092_v32, %v5088_v26  ;;  %v4445_v32 = vld [vmem:[%s5873_s6 + $0x28] sm:$0xff] }
0x1518   :  { %4819 = vmatmul.mubr.msk.f32.vlgmr.msra.gmra.mrb[30].mxu1 %vm209_vm2, %v2467_v34  ;;  %v4444_v34 = vld [vmem:[%s5873_s6 + $0x20] sm:$0xff] }
0x1519   :  { %4827 = vmatpush3.xpose.msk.msra.mxu1 %vm209_vm2, %v2701_v45  ;;  %4828 = vmatprep.mubr.msk.f32.mxu1 %vm5158_vm1, %v5157_v36 }
0x151a   :  { %4836 = vmatprep.subr.mxu1 %v5157_v36 }
0x151c   :  { %4829 = vmatmul.mubr.msk.f32.vlgmr.msra.gmra.mrb[32].mxu1 %vm209_vm2, %v2699_v27 }
0x151d   :  { %4838 = vmatprep.mubr.msk.f32.mxu1 %vm5158_vm1, %v5157_v36 }
0x1543   :  { %v2460_v37 = vpop.xlane.xlu0 %2459 }
0x1544   :  { %5093 = vrcp.f32 %v2460_v37 }
0x1547   :  { %v2469_v38 = vpop.permute.xlu0 %2468 }
0x1548   :  { %4812 = vmatpush3.msra.mxu0 %v2469_v38 }
0x1549   :  { %4821 = vmatprep.subr.mxu0 %v5157_v36 }
0x154e   :  { %v5094_v40 = vpop.eup %5093 }
0x154f   :  { %v2466_v43 = vmul.f32 %v5094_v40, %v5090_v28 }
0x1551   :  { %4814 = vmatmul.mubr.msk.f32.vlgmr.msra.gmra.mrb[16].mxu0 %vm209_vm2, %v2466_v43 }
0x1552   :  { %4822 = vmatpush3.xpose.msk.msra.mxu0 %vm209_vm2, %v2623_v42  ;;  %4823 = vmatprep.mubr.msk.f32.mxu0 %vm5158_vm1, %v5157_v36 }
0x1553   :  { %4831 = vmatprep.subr.mxu0 %v5157_v36 }
0x1555   :  { %4824 = vmatmul.mubr.msk.f32.vlgmr.msra.gmra.mrb[18].mxu0 %vm209_vm2, %v2621_v44 }
0x1556   :  { %4833 = vmatprep.mubr.msk.f32.mxu0 %vm5158_vm1, %v5157_v36 }
0x15eb   :  { %v5646_v46 = vpop.f32.mrb[30].mxu1 }
0x15ec   :  { %v4820_v47 = vpop.f32.mrb[31].mxu1 }
0x15ef   :  { %v2772_v48 = vpop.f32.mrb[32].mxu1 }
0x15f0   :  { %v2777_v49 = vmul.f32 0.35355338, %v2772_v48  ;;  %v4830_v51 = vpop.f32.mrb[33].mxu1 }
0x15f2   :  { %v2779_v53 = vadd.f32 %v5651_v52, %v2777_v49 }
0x15f4   :  { %v2783_v54 = vsel %vm209_vm2, %v2779_v53, -inf }
0x15f5   :  { %2784 = vmax.xlane.f32.xlu0 %v2783_v54 }
0x160b   :  { %2878 = vrot.lane.b32.xlu0 %v5588_v7, %s5164_s26 }
0x160f   :  { %3116 = vrot.lane.b32.xlu0 %v5590_v9, %s5165_s27 }
0x1613   :  { %3194 = vrot.lane.b32.xlu0 %v5588_v7, %s5165_s27 }
0x1624   :  { %v5661_v55 = vpop.f32.mrb[16].mxu0 }
0x1625   :  { %v4815_v56 = vpop.f32.mrb[17].mxu0 }
0x1628   :  { %v2694_v57 = vpop.f32.mrb[18].mxu0 }
0x1629   :  { %v4825_v58 = vpop.f32.mrb[19].mxu0  ;;  %v2776_v1 = vmul.f32 0.35355338, %v2694_v57 }
0x162a   :  { %v4446_v58 = vld [vmem:[%s5873_s6 + $0x30] sm:$0xff] }
0x162b   :  { %v2778_v3 = vadd.f32 %v5670_v2, %v2776_v1 }
0x162d   :  { %v2780_v39 = vsel %vm209_vm2, %v2778_v3, -inf }
0x1682   :  { %v2785_v59 = vpop.xlane.xlu0 %2784 }
0x1683   :  { %v2787_v60 = vsub.f32 %v2779_v53, %v2785_v59 }
0x1685   :  { %v2790_v61 = vmul.f32 1.442695, %v2787_v60 }
0x1686   :  { %v2879_v62 = vpop.permute.xlu0 %2878 }
0x1687   :  { %5095 = vpow2.f32 %v2790_v61  ;;  %4837 = vmatpush3.msra.mxu1 %v2879_v62 }
0x1688   :  { %4851 = vmatprep.subr.mxu1 %v5157_v36 }
0x168a   :  { %v3117_v11 = vpop.permute.xlu0 %3116 }
0x168e   :  { %v3195_v13 = vpop.permute.xlu0 %3194 }
0x1691   :  { %v5096_v63 = vpop.eup %5095 }
0x1692   :  { %v2795_v0 = vsel %vm209_vm2, %v5096_v63, 0.0 }
0x1693   :  { %2796 = vadd.xlane.f32.xlu1 %v2795_v0 }
0x16a4   :  { %3196 = vrot.lane.b32.xlu1 %v5588_v7, %s5163_s25  ;;  %s5904_s25 = smov 104  }
0x16c8   :  { %2781 = vmax.xlane.f32.xlu1 %v2780_v39 }
0x1720   :  { %v2797_v41 = vpop.xlane.xlu1 %2796 }
0x1721   :  { %5097 = vrcp.f32 %v2797_v41 }
0x1724   :  { %v3197_v12 = vpop.permute.xlu1 %3196 }
0x172b   :  { %v5098_v8 = vpop.eup %5097 }
0x172c   :  { %v2801_v10 = vmul.f32 %v5098_v8, %v5096_v63 }
0x172e   :  { %4839 = vmatmul.mubr.msk.f32.vlgmr.msra.gmra.mrb[34].mxu1 %vm209_vm2, %v2801_v10 }
0x172f   :  { %4852 = vmatpush3.xpose.msk.msra.mxu1 %vm209_vm2, %v3119_v6  ;;  %4853 = vmatprep.mubr.msk.f32.mxu1 %vm5158_vm1, %v5157_v36 }
0x1730   :  { %4856 = vmatprep.subr.mxu1 %v5157_v36 }
0x1732   :  { %4854 = vmatmul.mubr.msk.f32.vlgmr.msra.gmra.mrb[36].mxu1 %vm209_vm2, %v3117_v11 }
0x1733   :  { %4857 = vmatpush3.xpose.msk.msra.mxu1 %vm209_vm2, %v3197_v12  ;;  %4858 = vmatprep.mubr.msk.f32.mxu1 %vm5158_vm1, %v5157_v36 }
0x1734   :  { %4866 = vmatprep.subr.mxu1 %v5157_v36 }
0x1736   :  { %4859 = vmatmul.mubr.msk.f32.vlgmr.msra.gmra.mrb[38].mxu1 %vm209_vm2, %v3195_v13 }
0x1737   :  { %4868 = vmatprep.mubr.msk.f32.mxu1 %vm5158_vm1, %v5157_v36 }
0x1755   :  { %v2782_v14 = vpop.xlane.xlu1 %2781 }
0x1756   :  { %v2786_v16 = vsub.f32 %v2778_v3, %v2782_v14 }
0x1758   :  { %v2788_v17 = vmul.f32 1.442695, %v2786_v16 }
0x175a   :  { %5099 = vpow2.f32 %v2788_v17 }
0x1764   :  { %v5100_v19 = vpop.eup %5099 }
0x1765   :  { %v2792_v20 = vsel %vm209_vm2, %v5100_v19, 0.0 }
0x1766   :  { %2793 = vadd.xlane.f32.xlu0 %v2792_v20 }
0x177c   :  { %2802 = vrot.lane.b32.xlu0 %v5590_v9, %s5164_s26 }
0x1780   :  { %3374 = vrot.lane.b32.xlu0 %v5588_v7, %s5902_s20 }
0x1784   :  { %3535 = vrot.lane.b32.xlu0 %v5590_v9, %s5903_s24 }
0x1788   :  { %3613 = vrot.lane.b32.xlu0 %v5588_v7, %s5903_s24 }
0x178c   :  { %3533 = vrot.lane.b32.xlu0 %v5590_v9, %s5904_s25 }
0x17f3   :  { %v2794_v21 = vpop.xlane.xlu0 %2793 }
0x17f4   :  { %5101 = vrcp.f32 %v2794_v21 }
0x17f7   :  { %v2803_v22 = vpop.permute.xlu0 %2802 }
0x17f8   :  { %4832 = vmatpush3.msra.mxu0 %v2803_v22 }
0x17f9   :  { %4841 = vmatprep.subr.mxu0 %v4445_v32 }
0x17fb   :  { %v3375_v23 = vpop.permute.xlu0 %3374 }
0x17fc   :  { %4867 = vmatpush3.msra.mxu1 %v3375_v23 }
0x17fd   :  { %4876 = vmatprep.subr.mxu1 %v5157_v36 }
0x17fe   :  { %v5102_v50 = vpop.eup %5101 }
0x17ff   :  { %v2800_v24 = vmul.f32 %v5102_v50, %v5100_v19  ;;  %v3536_v60 = vpop.permute.xlu0 %3535 }
0x1801   :  { %4834 = vmatmul.mubr.msk.f32.vlgmr.msra.gmra.mrb[20].mxu0 %vm209_vm2, %v2800_v24  ;;  %v2950_v25 = vpop.f32.mrb[34].mxu1 }
0x1802   :  { %v4840_v26 = vpop.f32.mrb[35].mxu1  ;;  %4842 = vmatpush3.msra.mxu0 %v4445_v32 }
0x1803   :  { %4846 = vmatprep.subr.mxu0 %v4444_v34  ;;  %v3614_v62 = vpop.permute.xlu0 %3613 }
0x1805   :  { %v3190_v15 = vpop.f32.mrb[36].mxu1 }
0x1806   :  { %v3272_v45 = vmul.f32 0.35355338, %v3190_v15  ;;  %v4855_v27 = vpop.f32.mrb[37].mxu1 }
0x1807   :  { %v3534_v0 = vpop.permute.xlu0 %3533 }
0x1808   :  { %v3274_v18 = vadd.f32 %v5670_v2, %v3272_v45 }
0x1809   :  { %v3268_v35 = vpop.f32.mrb[38].mxu1 }
0x180a   :  { %v3273_v33 = vmul.f32 0.35355338, %v3268_v35  ;;  %v4860_v28 = vpop.f32.mrb[39].mxu1  ;;  %v3276_v29 = vsel %vm209_vm2, %v3274_v18, -inf }
0x180b   :  { %3277 = vmax.xlane.f32.xlu1 %v3276_v29 }
0x180c   :  { %v3275_v30 = vadd.f32 %v5651_v52, %v3273_v33 }
0x180e   :  { %v3279_v31 = vsel %vm209_vm2, %v3275_v30, -inf }
0x180f   :  { %3280 = vmax.xlane.f32.xlu1 %v3279_v31 }
0x1898   :  { %v3278_v37 = vpop.xlane.xlu1 %3277 }
0x1899   :  { %v3282_v38 = vsub.f32 %v3274_v18, %v3278_v37  ;;  %v4481_v37 = vld [vmem:[%s5874_s7 + $0x1] ss:$0 sm:$0xff] }
0x189b   :  { %v3284_v40 = vmul.f32 1.442695, %v3282_v38 }
0x189c   :  { %v3281_v42 = vpop.xlane.xlu1 %3280 }
0x189d   :  { %5103 = vpow2.f32 %v3284_v40  ;;  %v3283_v43 = vsub.f32 %v3275_v30, %v3281_v42  ;;  %v4447_v30 = vld [vmem:[%s5873_s6 + $0x38] sm:$0xff] }
0x189f   :  { %v3286_v44 = vmul.f32 1.442695, %v3283_v43 }
0x18a1   :  { %5105 = vpow2.f32 %v3286_v44 }
0x18a7   :  { %v5104_v47 = vpop.eup %5103 }
0x18a8   :  { %v3288_v48 = vsel %vm209_vm2, %v5104_v47, 0.0 }
0x18a9   :  { %3289 = vadd.xlane.f32.xlu1 %v3288_v48 }
0x18ab   :  { %v5106_v49 = vpop.eup %5105 }
0x18ac   :  { %v3291_v51 = vsel %vm209_vm2, %v5106_v49, 0.0 }
0x18ad   :  { %3292 = vadd.xlane.f32.xlu1 %v3291_v51 }
0x18be   :  { %3298 = vrot.lane.b32.xlu1 %v5590_v9, %s5902_s20 }
0x18c2   :  { %3611 = vrot.lane.b32.xlu1 %v5588_v7, %s5904_s25 }
0x18d4   :  { %v2874_v53 = vpop.f32.mrb[20].mxu0 }
0x18d5   :  { %v4835_v54 = vpop.f32.mrb[21].mxu0  ;;  %4843 = vmatprep.mubr.msk.f32.mxu0 %vm209_vm2, %v2874_v53 }
0x18d6   :  { %4844 = vmatmul.mubr.msk.f32.vlgmr.msra.gmra.mrb[22].mxu0 %vm209_vm2, %v2950_v25 }
0x18d7   :  { %4848 = vmatprep.mubr.msk.f32.mxu0 %vm209_vm2, %v5661_v55  ;;  %4847 = vmatpush3.msra.mxu0 %v4444_v34 }
0x18d8   :  { %4861 = vmatprep.subr.mxu0 %v5157_v36 }
0x18de   :  { %4849 = vmatmul.mubr.msk.f32.vlgmr.msra.gmra.mrb[22].mxu0 %vm209_vm2, %v5646_v46 }
0x18df   :  { %4863 = vmatprep.mubr.msk.f32.mxu0 %vm5158_vm1, %v5157_v36 }
0x1936   :  { %v3290_v56 = vpop.xlane.xlu1 %3289 }
0x1937   :  { %5107 = vrcp.f32 %v3290_v56 }
0x193a   :  { %v3293_v57 = vpop.xlane.xlu1 %3292 }
0x193b   :  { %5109 = vrcp.f32 %v3293_v57 }
0x193e   :  { %v3299_v59 = vpop.permute.xlu1 %3298 }
0x193f   :  { %4862 = vmatpush3.msra.mxu0 %v3299_v59 }
0x1940   :  { %4871 = vmatprep.subr.mxu0 %v4446_v58 }
0x1941   :  { %v5108_v55 = vpop.eup %5107 }
0x1942   :  { %v3296_v61 = vmul.f32 %v5108_v55, %v5104_v47  ;;  %v3612_v41 = vpop.permute.xlu1 %3611 }
0x1944   :  { %4864 = vmatmul.mubr.msk.f32.vlgmr.msra.gmra.mrb[24].mxu0 %vm209_vm2, %v3296_v61  ;;  %v4487_v61 = vld [vmem:[%s5877_s10 + $0x28] sm:$0xff] }
0x1945   :  { %v5110_v46 = vpop.eup %5109  ;;  %4872 = vmatpush3.msra.mxu0 %v4446_v58 }
0x1946   :  { %v3297_v63 = vmul.f32 %v5110_v46, %v5106_v49  ;;  %4881 = vmatprep.subr.mxu0 %v5157_v36 }
0x1948   :  { %4869 = vmatmul.mubr.msk.f32.vlgmr.msra.gmra.mrb[40].mxu1 %vm209_vm2, %v3297_v63  ;;  %v4489_v63 = vld [vmem:[%s5877_s10 + $0x38] sm:$0xff] }
0x1949   :  { %4877 = vmatpush3.xpose.msk.msra.mxu1 %vm209_vm2, %v3536_v60  ;;  %4878 = vmatprep.mubr.msk.f32.mxu1 %vm5158_vm1, %v5157_v36 }
0x194a   :  { %4886 = vmatprep.subr.mxu1 %v5157_v36 }
0x194c   :  { %4879 = vmatmul.mubr.msk.f32.vlgmr.msra.gmra.mrb[42].mxu1 %vm209_vm2, %v3534_v0 }
0x194d   :  { %4888 = vmatprep.mubr.msk.f32.mxu1 %vm5158_vm1, %v5157_v36 }
0x1a17   :  { %v3370_v1 = vpop.f32.mrb[24].mxu0 }
0x1a18   :  { %v4865_v3 = vpop.f32.mrb[25].mxu0  ;;  %4873 = vmatprep.mubr.msk.f32.mxu0 %vm209_vm2, %v3370_v1 }
0x1a1b   :  { %v3446_v39 = vpop.f32.mrb[40].mxu1 }
0x1a1c   :  { %v4870_v6 = vpop.f32.mrb[41].mxu1  ;;  %4874 = vmatmul.mubr.msk.f32.vlgmr.msra.gmra.mrb[22].mxu0 %vm209_vm2, %v3446_v39 }
0x1a1d   :  { %4882 = vmatpush3.xpose.msk.msra.mxu0 %vm209_vm2, %v3614_v62  ;;  %4883 = vmatprep.mubr.msk.f32.mxu0 %vm5158_vm1, %v5157_v36  ;;  %v4488_v62 = vld [vmem:[%s5877_s10 + $0x30] sm:$0xff] }
0x1a1e   :  { %4891 = vmatprep.subr.mxu0 %v5157_v36  ;;  %v4986_v0 = vpack.c.bf16 %v4489_v63, %v4488_v62 }
0x1a1f   :  { %v3607_v8 = vpop.f32.mrb[42].mxu1 }
0x1a20   :  { %v3689_v10 = vmul.f32 0.35355338, %v3607_v8  ;;  %v4880_v11 = vpop.f32.mrb[43].mxu1  ;;  %4884 = vmatmul.mubr.msk.f32.vlgmr.msra.gmra.mrb[26].mxu0 %vm209_vm2, %v3612_v41 }
0x1a21   :  { %4893 = vmatprep.mubr.msk.f32.mxu0 %vm5158_vm1, %v5157_v36  ;;  %v4484_v11 = vld [vmem:[%s5875_s8 + $0x1] ss:$0 sm:$0xff] }
0x1a22   :  { %v3691_v12 = vadd.f32 %v5670_v2, %v3689_v10 }
0x1a24   :  { %v3693_v13 = vsel %vm209_vm2, %v3691_v12, -inf }
0x1a25   :  { %3694 = vmax.xlane.f32.xlu0 %v3693_v13 }
0x1ab2   :  { %v3695_v14 = vpop.xlane.xlu0 %3694 }
0x1ab3   :  { %v3699_v16 = vsub.f32 %v3691_v12, %v3695_v14 }
0x1ab5   :  { %v3701_v17 = vmul.f32 1.442695, %v3699_v16  ;;  %v4485_v16 = vld [vmem:[%s5876_s9 + $0x1] ss:$0 sm:$0xff] }
0x1ab7   :  { %5111 = vpow2.f32 %v3701_v17 }
0x1ac1   :  { %v5112_v19 = vpop.eup %5111 }
0x1ac2   :  { %v3705_v20 = vsel %vm209_vm2, %v5112_v19, 0.0 }
0x1ac3   :  { %3706 = vadd.xlane.f32.xlu0 %v3705_v20 }
0x1af3   :  { %v3685_v21 = vpop.f32.mrb[26].mxu0 }
0x1af4   :  { %v3690_v22 = vmul.f32 0.35355338, %v3685_v21  ;;  %v4885_v23 = vpop.f32.mrb[27].mxu0 }
0x1af5   :  { %v4495_v23 = vld [vmem:[%s5879_s12 + $0x48] sm:$0xff] }
0x1af6   :  { %v3692_v50 = vadd.f32 %v5651_v52, %v3690_v22  ;;  %v4494_v22 = vld [vmem:[%s5879_s12 + $0x40] sm:$0xff] }
0x1af8   :  { %v3696_v24 = vsel %vm209_vm2, %v3692_v50, -inf }
0x1af9   :  { %3697 = vmax.xlane.f32.xlu1 %v3696_v24  ;;  %v4496_v24 = vld [vmem:[%s5879_s12 + $0x50] sm:$0xff] }
0x1b0a   :  { %3791 = vrot.lane.b32.xlu1 %v5588_v7, %s5905_s19 }
0x1b50   :  { %v3707_v52 = vpop.xlane.xlu0 %3706 }
0x1b86   :  { %v3698_v2 = vpop.xlane.xlu1 %3697 }
0x1b87   :  { %v3700_v25 = vsub.f32 %v3692_v50, %v3698_v2  ;;  %v4990_v50 = vpack.c.bf16 %v4495_v23, %v4494_v22  ;;  %v4497_v2 = vld [vmem:[%s5879_s12 + $0x58] sm:$0xff] }
0x1b89   :  { %v3703_v26 = vmul.f32 1.442695, %v3700_v25  ;;  %v4498_v25 = vld [vmem:[%s5879_s12 + $0x60] sm:$0xff] }
0x1b8a   :  { %v3792_v15 = vpop.permute.xlu1 %3791 }
0x1b8b   :  { %5113 = vpow2.f32 %v3703_v26  ;;  %4892 = vmatpush3.msra.mxu0 %v3792_v15  ;;  %v4499_v26 = vld [vmem:[%s5879_s12 + $0x68] sm:$0xff] }
0x1b8c   :  { %5115 = vrcp.f32 %v3707_v52  ;;  %4896 = vmatprep.subr.mxu0 %v4447_v30  ;;  %v4998_v15 = vpack.c.bf16 %v4499_v26, %v4498_v25  ;;  %v4509_v26 = vld [vmem:[%s5882_s15 + $0x1] ss:$0 sm:$0xff] }
0x1b95   :  { %v5114_v45 = vpop.eup %5113 }
0x1b96   :  { %v3708_v27 = vsel %vm209_vm2, %v5114_v45, 0.0  ;;  %v5116_v35 = vpop.eup %5115 }
0x1b97   :  { %3709 = vadd.xlane.f32.xlu0 %v3708_v27  ;;  %v3713_v33 = vmul.f32 %v5116_v35, %v5112_v19  ;;  %v4501_v27 = vld [vmem:[%s5879_s12 + $0x78] sm:$0xff] }
0x1bad   :  { %3715 = vrot.lane.b32.xlu0 %v5590_v9, %s5905_s19  ;;  %s4378_s19 = sshll.u32 %s5171_s3, 4  ;;  %s4379_s19 = int_to_ptr.vmem [resolvable:$true] %s4378_s19 }
0x1bae   :  { %s5133_s4 = scalar_lea.vmem %s4379_s19, 32  ;;  %p5138_p1 = scmp.lt.s32.totalorder %s4379_s19, %s4379_s19 }
0x1baf   :  { %p5134_p0 = scmp.ne.s32.totalorder %s4379_s19, %s5133_s4  ;;  %p5139_p2 = scmp.lt.s32.totalorder %s5133_s4, %s5133_s4 }
0x1bb1   :  { %p5140_p3 = por %p5139_p2, %p5138_p1 }
0x1bb3   :  { %p5141_p4 = pnand %p5140_p3, %p5134_p0 }
0x1c24   :  { %v3710_v18 = vpop.xlane.xlu0 %3709 }
0x1c25   :  { %5117 = vrcp.f32 %v3710_v18  ;;  %v4491_v18 = vld [vmem:[%s5878_s11 + $0x1] ss:$0 sm:$0xff] }
0x1c28   :  { %v3716_v7 = vpop.permute.xlu0 %3715 }
0x1c29   :  { %4887 = vmatpush3.msra.mxu1 %v3716_v7 }
0x1c2a   :  { %4889 = vmatmul.mubr.msk.f32.vlgmr.msra.gmra.mrb[44].mxu1 %vm209_vm2, %v3713_v33 }
0x1c2f   :  { %v5118_v28 = vpop.eup %5117 }
0x1c30   :  { %v3714_v29 = vmul.f32 %v5118_v28, %v5114_v45  ;;  %v4500_v45 = vld [vmem:[%s5879_s12 + $0x70] sm:$0xff] }
0x1c31   :  { %v5002_v52 = vpack.c.bf16 %v4501_v27, %v4500_v45 }
0x1c32   :  { %4894 = vmatmul.mubr.msk.f32.vlgmr.msra.gmra.mrb[28].mxu0 %vm209_vm2, %v3714_v29 }
0x1c33   :  { %4897 = vmatpush3.msra.mxu0 %v4447_v30 }
0x1c34   :  { %4991 = vmatprep.subr.bf16.mxu0 %v4990_v50 }
0x1cfd   :  { %v3787_v9 = vpop.f32.mrb[44].mxu1 }
0x1cfe   :  { %v4890_v31 = vpop.f32.mrb[45].mxu1  ;;  %4898 = vmatprep.mubr.msk.f32.mxu0 %vm209_vm2, %v3787_v9 }
0x1d05   :  { %v3863_v32 = vpop.f32.mrb[28].mxu0 }
0x1d06   :  { %v4895_v34 = vpop.f32.mrb[29].mxu0  ;;  %4899 = vmatmul.mubr.msk.f32.vlgmr.msra.gmra.mrb[22].mxu0 %vm209_vm2, %v3863_v32 }
0x1d07   :  { %4993 = vmatpush3.bf16.msra.mxu0 %v4990_v50 }
0x1dd9   :  { %v4900_v38 = vpop.f32.mrb[22].mxu0 }
0x1dda   :  { %v3959_v40 = vadd.f32 %v4900_v38, %v4481_v37  ;;  %v3939_v42 = vpop.f32.mrb[23].mxu0 }
0x1ddb   :  { %v3958_v43 = vadd.f32 %v4481_v37, %v3939_v42 }
0x1ddc   :  { %v3961_v44 = vadd.f32 %v3959_v40, %v5577_v5 }
0x1ddd   :  { %v3960_v47 = vadd.f32 %v3958_v43, %v5575_v4  ;;  %v4486_v4 = vld [vmem:[%s5877_s10 + $0x20] sm:$0xff] }
0x1dde   :  { %v3969_v48 = vsel %vm64_vm0, %v3961_v44, 0.0  ;;  %v4982_v46 = vpack.c.bf16 %v4487_v61, %v4486_v4 }
0x1ddf   :  { %3970 = vadd.xlane.f32.xlu0 %v3969_v48  ;;  %v3966_v49 = vsel %vm64_vm0, %v3960_v47, 0.0 }
0x1de0   :  { %3967 = vadd.xlane.f32.xlu1 %v3966_v49  ;;  %4983 = vmatprep.subr.bf16.mxu1 %v4982_v46 }
0x1de1   :  { %4985 = vmatpush3.bf16.msra.mxu1 %v4982_v46 }
0x1de2   :  { %4987 = vmatprep.subr.bf16.mxu1 %v4986_v0 }
0x1de5   :  { %4989 = vmatpush3.bf16.msra.mxu1 %v4986_v0 }
0x1e6c   :  { %v3971_v51 = vpop.xlane.xlu0 %3970 }
0x1e6d   :  { %v3973_v53 = vmul.f32 0.03125, %v3971_v51  ;;  %v3968_v54 = vpop.xlane.xlu1 %3967 }
0x1e6e   :  { %v3972_v56 = vmul.f32 0.03125, %v3968_v54 }
0x1e6f   :  { %v3975_v57 = vsub.f32 %v3961_v44, %v3973_v53 }
0x1e70   :  { %v3974_v58 = vsub.f32 %v3960_v47, %v3972_v56  ;;  %v4503_v56 = vld [vmem:[%s5880_s13 + $0x1] ss:$0 sm:$0xff] }
0x1e71   :  { %v3977_v59 = vmul.f32 %v3975_v57, %v3975_v57 }
0x1e72   :  { %v3976_v60 = vmul.f32 %v3974_v58, %v3974_v58 }
0x1e73   :  { %v3981_v55 = vsel %vm64_vm0, %v3977_v59, 0.0 }
0x1e74   :  { %3982 = vadd.xlane.f32.xlu1 %v3981_v55  ;;  %v3978_v5 = vsel %vm64_vm0, %v3976_v60, 0.0 }
0x1e75   :  { %3979 = vadd.xlane.f32.xlu0 %v3978_v5 }
0x1f01   :  { %v3983_v1 = vpop.xlane.xlu1 %3982 }
0x1f02   :  { %v3985_v3 = vmul.f32 0.03125, %v3983_v1  ;;  %v3980_v39 = vpop.xlane.xlu0 %3979 }
0x1f03   :  { %v3984_v6 = vmul.f32 0.03125, %v3980_v39 }
0x1f04   :  { %v3987_v41 = vadd.f32 1e-05, %v3985_v3 }
0x1f05   :  { %v3986_v8 = vadd.f32 1e-05, %v3984_v6 }
0x1f06   :  { %5119 = vrsqrt.f32 %v3987_v41 }
0x1f07   :  { %5121 = vrsqrt.f32 %v3986_v8 }
0x1f10   :  { %v5120_v10 = vpop.eup %5119 }
0x1f11   :  { %v5122_v12 = vpop.eup %5121  ;;  %v3991_v13 = vmul.f32 %v5120_v10, %v3975_v57  ;;  %v4283_v10 = vld [vmem:[%s5883_s16] sm:$0xff] }
0x1f12   :  { %v3990_v14 = vmul.f32 %v5122_v12, %v3974_v58  ;;  %v4285_v12 = vld [vmem:[%s5883_s16 + $0x10] sm:$0xff] }
0x1f13   :  { %v3999_v17 = vmul.f32 %v4484_v11, %v3991_v13  ;;  %v5170_v13 = vmov 0.0|0.0  }
0x1f14   :  { %v3998_v19 = vmul.f32 %v4484_v11, %v3990_v14  ;;  %v4284_v11 = vld [vmem:[%s5883_s16 + $0x8] sm:$0xff]  ;;  %5006 = vmatprep.subr.bf16.mxu1 %v5170_v13 }
0x1f15   :  { %v4007_v21 = vadd.f32 %v4485_v16, %v3999_v17  ;;  %v5007_v14 = vpack.c.bf16 %v4284_v11, %v4283_v10 }
0x1f16   :  { %v4006_v20 = vadd.f32 %v4485_v16, %v3998_v19  ;;  %v4286_v16 = vld [vmem:[%s5883_s16 + $0x18] sm:$0xff] }
0x1f17   :  { %v5010_v17 = vpack.c.bf16 %v4286_v16, %v4285_v12 }
0x1f18   :  { %4909 = vmatprep.mubr.msk.f32.mxu1 %vm64_vm0, %v4006_v20 }
0x1f19   :  { %4910 = vmatmul.mubr.msk.f32.vlgmr.msra.gmra.mrb[46].mxu1 %vm64_vm0, %v4007_v21 }
0x1f1a   :  { %4939 = vmatprep.mubr.msk.f32.mxu1 %vm5158_vm1, %v5157_v36  ;;  %v4994_v36 = vpack.c.bf16 %v4497_v2, %v4496_v24  ;;  %5008 = vmatpush3.bf16.msra.mxu1 %v5007_v14  ;;  %v4508_v2 = vld [vmem:[%s5881_s14 + $0x1] ss:$0 sm:$0xff] }
0x1f1b   :  { %5009 = vmatprep.subr.bf16.mxu1 %v5170_v13 }
0x1f1c   :  { %4995 = vmatprep.subr.bf16.mxu0 %v4994_v36 }
0x1f1d   :  { %4997 = vmatpush3.bf16.msra.mxu0 %v4994_v36 }
0x1f1e   :  { %4999 = vmatprep.subr.bf16.mxu0 %v4998_v15  ;;  %5011 = vmatpush3.bf16.msra.mxu1 %v5010_v17 }
0x1f21   :  { %5001 = vmatpush3.bf16.msra.mxu0 %v4998_v15 }
0x1f22   :  { %5003 = vmatprep.subr.bf16.mxu0 %v5002_v52 }
0x1f25   :  { %5005 = vmatpush3.bf16.msra.mxu0 %v5002_v52 }
0x1fec   :  { %v4911_v35 = vpop.f32.mrb[46].mxu1 }
0x1fed   :  { %v4099_v33 = vadd.f32 %v4911_v35, %v4491_v18  ;;  %v4093_v7 = vpop.f32.mrb[47].mxu1 }
0x1fee   :  { %v4094_v28 = vadd.f32 %v4491_v18, %v4093_v7 }
0x1fef   :  { %v4103_v29 = vmul.f32 %v4099_v33, %v4099_v33 }
0x1ff0   :  { %v4102_v30 = vmul.f32 %v4094_v28, %v4094_v28 }
0x1ff1   :  { %v4105_v9 = vmul.f32 %v4103_v29, %v4099_v33 }
0x1ff2   :  { %v4104_v31 = vmul.f32 %v4102_v30, %v4094_v28 }
0x1ff3   :  { %v4107_v32 = vmul.f32 0.044715, %v4105_v9 }
0x1ff4   :  { %v4106_v34 = vmul.f32 0.044715, %v4104_v31 }
0x1ff5   :  { %v4109_v37 = vadd.f32 %v4107_v32, %v4099_v33 }
0x1ff6   :  { %v4108_v38 = vadd.f32 %v4106_v34, %v4094_v28 }
0x1ff7   :  { %v4111_v40 = vmul.f32 0.7978846, %v4109_v37 }
0x1ff8   :  { %v4110_v42 = vmul.f32 0.7978846, %v4108_v38 }
0x1ff9   :  { %5123 = vtanh.f32 %v4111_v40 }
0x1ffa   :  { %5125 = vtanh.f32 %v4110_v42 }
0x2003   :  { %v5124_v43 = vpop.eup %5123 }
0x2004   :  { %v5126_v44 = vpop.eup %5125  ;;  %v4115_v47 = vadd.f32 1.0, %v5124_v43 }
0x2005   :  { %v4114_v48 = vadd.f32 1.0, %v5126_v44 }
0x2006   :  { %v4117_v49 = vmul.f32 0.5, %v4115_v47 }
0x2007   :  { %v4116_v51 = vmul.f32 0.5, %v4114_v48  ;;  %v4510_v48 = vld [vmem:[%s5884_s17] ss:$0 sm:$0xff] }
0x2008   :  { %v4119_v54 = vmul.f32 %v4117_v49, %v4099_v33 }
0x2009   :  { %v4118_v53 = vmul.f32 %v4116_v51, %v4094_v28 }
0x200b   :  { %4928 = vmatprep.mubr.msk.f32.mxu0 %vm2061_vm3, %v4118_v53 }
0x200c   :  { %4929 = vmatmul.mubr.msk.f32.vlgmr.msra.gmra.mrb[30].mxu0 %vm2061_vm3, %v4119_v54 }
0x20df   :  { %v4930_v57 = vpop.f32.mrb[30].mxu0 }
0x20e0   :  { %v4215_v58 = vadd.f32 %v4930_v57, %v4503_v56  ;;  %v4209_v59 = vpop.f32.mrb[31].mxu0 }
0x20e1   :  { %v4210_v60 = vadd.f32 %v4503_v56, %v4209_v59 }
0x20e2   :  { %v4219_v55 = vadd.f32 %v4215_v58, %v4007_v21 }
0x20e3   :  { %v4218_v5 = vadd.f32 %v4210_v60, %v4006_v20 }
0x20e4   :  { %v4227_v4 = vsel %vm64_vm0, %v4219_v55, 0.0 }
0x20e5   :  { %4228 = vadd.xlane.f32.xlu1 %v4227_v4  ;;  %v4224_v61 = vsel %vm64_vm0, %v4218_v5, 0.0 }
0x20e6   :  { %4225 = vadd.xlane.f32.xlu0 %v4224_v61 }
0x2172   :  { %v4229_v46 = vpop.xlane.xlu1 %4228 }
0x2173   :  { %v4231_v62 = vmul.f32 0.03125, %v4229_v46  ;;  %v4226_v63 = vpop.xlane.xlu0 %4225 }
0x2174   :  { %v4230_v0 = vmul.f32 0.03125, %v4226_v63 }
0x2175   :  { %v4233_v1 = vsub.f32 %v4219_v55, %v4231_v62 }
0x2176   :  { %v4232_v3 = vsub.f32 %v4218_v5, %v4230_v0 }
0x2177   :  { %v4235_v39 = vmul.f32 %v4233_v1, %v4233_v1 }
0x2178   :  { %v4234_v6 = vmul.f32 %v4232_v3, %v4232_v3 }
0x2179   :  { %v4239_v41 = vsel %vm64_vm0, %v4235_v39, 0.0 }
0x217a   :  { %4240 = vadd.xlane.f32.xlu1 %v4239_v41  ;;  %v4236_v8 = vsel %vm64_vm0, %v4234_v6, 0.0 }
0x217b   :  { %4237 = vadd.xlane.f32.xlu0 %v4236_v8 }
0x2207   :  { %v4241_v19 = vpop.xlane.xlu1 %4240 }
0x2208   :  { %v4243_v20 = vmul.f32 0.03125, %v4241_v19  ;;  %v4238_v21 = vpop.xlane.xlu0 %4237 }
0x2209   :  { %v4242_v22 = vmul.f32 0.03125, %v4238_v21 }
0x220a   :  { %v4245_v23 = vadd.f32 1e-05, %v4243_v20 }
0x220b   :  { %v4244_v50 = vadd.f32 1e-05, %v4242_v22 }
0x220c   :  { %5127 = vrsqrt.f32 %v4245_v23 }
0x220d   :  { %5129 = vrsqrt.f32 %v4244_v50 }
0x2216   :  { %v5128_v24 = vpop.eup %5127 }
0x2217   :  { %v5130_v36 = vpop.eup %5129  ;;  %v4249_v25 = vmul.f32 %v5128_v24, %v4233_v1 }
0x2218   :  { %v4248_v15 = vmul.f32 %v5130_v36, %v4232_v3 }
0x2219   :  { %v4257_v45 = vmul.f32 %v4508_v2, %v4249_v25 }
0x221a   :  { %v4256_v27 = vmul.f32 %v4508_v2, %v4248_v15 }
0x221b   :  { %v4265_v52 = vadd.f32 %v4509_v26, %v4257_v45 }
0x221c   :  { %v4264_v18 = vadd.f32 %v4509_v26, %v4256_v27 }
0x221d   :  { %v4273_v35 = vsel %vm64_vm0, %v4265_v52, 0.0 }
0x221e   :  { %v4266_v33 = vsel %vm64_vm0, %v4264_v18, 0.0  ;;  %v4274_v7 = vrot.slane %v4273_v35, 4 }
0x221f   :  { %v4267_v28 = vrot.slane %v4266_v33, 4 }
0x2220   :  { %v4275_v29 = vadd.f32 %v4274_v7, %v4273_v35 }
0x2221   :  { %v4268_v30 = vadd.f32 %v4267_v28, %v4266_v33 }
0x2222   :  { %v4276_v9 = vrot.slane %v4275_v29, 2 }
0x2223   :  { %v4269_v31 = vrot.slane %v4268_v30, 2 }
0x2224   :  { %v4277_v32 = vadd.f32 %v4276_v9, %v4275_v29 }
0x2225   :  { %v4270_v34 = vadd.f32 %v4269_v31, %v4268_v30 }
0x2226   :  { %v4278_v37 = vrot.slane %v4277_v32, 1 }
0x2227   :  { %v4271_v38 = vrot.slane %v4270_v34, 1 }
0x2228   :  { %v4279_v40 = vadd.f32 %v4278_v37, %v4277_v32 }
0x2229   :  { %v4272_v42 = vadd.f32 %v4271_v38, %v4270_v34 }
0x222a   :  { %v4282_v43 = vmul.f32 0.125, %v4279_v40 }
0x222b   :  { %v4281_v44 = vmul.f32 0.125, %v4272_v42 }
0x222d   :  { %v4297_v47 = vsel %vm4296_vm4, %v4282_v43, %v4281_v44 }
0x222e   :  { %4940 = vmatmul.mubr.msk.f32.vlgmr.msra.gmra.mrb[48].mxu1 %vm64_vm0, %v4297_v47 }
0x2301   :  { %v4366_v49 = vpop.f32.mrb[48].mxu1 }
0x2302   :  { %v4367_v51 = vadd.f32 %v4510_v48, %v4366_v49  ;;  %v4941_v53 = vpop.f32.mrb[49].mxu1 }
0x2304   :  { %4371 = vst.msk [vmem:[#allocation2] sm:$0x3] %vm4370_vm5, %v4367_v51 }
0x2305   :  { %5144 = shalt.err (!%p5141_p4)
}
0x2306   :  { %s5145_s1 = scalar_lea.hbm %s5885_s18, 32 }
0x2307   :  { %p5146_p5 = scmp.ne.s32.totalorder %s5885_s18, %s5145_s1  ;;  %p5149_p6 = scmp.lt.u32.totalorder %s5145_s1, %s5885_s18 }
0x2309   :  { %p5151_p7 = pnand %p5149_p6, %p5146_p5 }
0x230b   :  { %5154 = shalt.err (!%p5151_p7)
}
0x230c   :  { %4381 = dma.vmem_to_hbm [thread:$0]  %s4379_s19, 32, %s5885_s18, [#allocation3]  }
0x230d   :  { %5155 = dma.done.wait [#allocation3], 32  }
0x230e   :  { %5156 = vsyncadd [#allocation3], 4294967264 }
0x230f   :  { %4385 = vsyncpa [#allocation3], 1 }

</bundles_post_ra>
